<compile_context>
chip_gen: v5e
topology: v5e:2x2
jax: 0.10.0
libtpu: 0.0.40
codegen_flags: <defaults>
</compile_context>

<pallas_src>
import functools
import math

import jax
import jax.numpy as jnp
from jax.experimental import pallas as pl
from jax.experimental.pallas import tpu as pltpu


def _round_up(x, m):
    return (x + m - 1) // m * m


def _vmem_capacity_bytes(default=64 * 1024 * 1024):
    try:
        info = pltpu.get_tpu_info()
        cap = int(getattr(info, "vmem_capacity_bytes", 0))
        return cap if cap > 0 else default
    except Exception:
        return default


# ------------------------- Pallas kernel -------------------------

def _conv_taps_kernel(x_ref, w_ref, b_ref, o_ref, acc_ref, *,
                      kh, kw, dH, dW, Wpad, Lout):
    # x_ref  : (1, cin_blk, Lx)            flat padded input slab (resident per (n, cin-blk))
    # w_ref  : (kh*kw, cout_blk, cin_blk)  per-tap weight slices
    # b_ref  : (cout_blk, 1) f32
    # o_ref  : (1, cout_blk, Lout)         NCHW-flat dense output block (lane-dense)
    # acc_ref: (cout_blk, Lout) f32        accumulator scratch (persists across cin steps)
    c = pl.program_id(2)

    @pl.when(c == 0)
    def _init():
        acc_ref[...] = jnp.zeros_like(acc_ref)

    # In-VMEM im2col: kh*kw statically shifted views of the resident slab, one MXU matmul
    # per kernel tap, f32 accumulation.  Offsets are compile-time constants.
    for ki in range(kh):
        for kj in range(kw):
            off = ki * dH * Wpad + kj * dW
            xs = x_ref[0, :, pl.ds(off, Lout)]           # (cin_blk, Lout) static slice
            acc_ref[...] += jnp.dot(w_ref[ki * kw + kj], xs,
                                    preferred_element_type=jnp.float32)

    @pl.when(c == pl.num_programs(2) - 1)
    def _finalize():
        o_ref[0, :, :] = (acc_ref[...] + b_ref[...]).astype(o_ref.dtype)


# ------------------------- Wrapper -------------------------

def lora_conv2d(x, lora_A, lora_B, bias, *, k, stride, padding, dilation,
                groups, scaling, compute_dtype=None):
    """LoRA-composed Conv2d forward. x: (N, Cin, H, W) NCHW -> (N, Cout, Hout, Wout)."""
    # TODO(synk): only groups == 1 and padding_mode == 'zeros' are implemented (the
    # reference module's weight .view() is only shape-consistent for groups == 1).
    assert groups == 1

    N, Cin, H, W = x.shape
    Cout = lora_B.shape[0] // Cin
    kh = kw = k
    sH, sW = stride
    pH, pW = padding
    dH, dW = dilation

    dtype = jnp.dtype(compute_dtype) if compute_dtype is not None else x.dtype
    itemsize = jnp.dtype(dtype).itemsize

    # Geometry.  The kernel always computes the dense (stride-1) conv over the padded
    # grid; strided outputs are subsampled in the wrapper afterwards.
    Hp, Wp = H + 2 * pH, W + 2 * pW
    Hd = Hp - dH * (kh - 1)                  # dense output rows
    Wd = Wp - dW * (kw - 1)                  # dense output cols
    assert Hd >= 1 and Wd >= 1
    Hout = (Hd - 1) // sH + 1
    Wout = (Wd - 1) // sW + 1

    Wpad = _round_up(Wp, 128)                # lane-dense padded width
    Lx = (Hp + 1) * Wpad                     # +1 zero row: largest tap shift stays in bounds
    Lout = Hd * Wpad                         # output lanes per image (multiple of 128)

    # ---- LoRA weight composition (tiny -> plain JAX), laid out as (kh*kw, Cout, Cin).
    w = (lora_B.astype(jnp.float32) @ lora_A.astype(jnp.float32)) * scaling
    w = w.reshape(Cout, Cin, kh * kw).transpose(2, 0, 1).astype(dtype)

    if bias is None:
        bias = jnp.zeros((Cout,), jnp.float32)
    bias2d = jnp.asarray(bias, jnp.float32).reshape(Cout, 1)

    # ---- per-generation VMEM budget and block sizes (no hard-coded 32 MiB / bn=512).
    vmem_cap = _vmem_capacity_bytes()
    vmem_limit = max(32 * 1024 * 1024, min(int(0.75 * vmem_cap), 100 * 1024 * 1024))
    budget = int(0.85 * vmem_limit)

    def footprint(ci_blk, co_blk):
        return ((2 * ci_blk * Lx                      # x slab (double-buffered)
                 + 2 * kh * kw * co_blk * ci_blk      # weights
                 + 2 * co_blk * Lout) * itemsize      # output block
                + 2 * co_blk * 4                      # bias (f32)
                + co_blk * Lout * 4)                  # f32 accumulator scratch

    # NOTE(review): the weight/bias index maps are constant over most of the grid, so
    # Pallas never re-DMAs them while the block index is unchanged; pl.Buffered(1) would
    # additionally halve their VMEM but is omitted here, and the budget above
    # conservatively counts two buffers instead.
    cout_blk = Cout if Cout <= 256 else 256
    cin_blk = Cin
    while footprint(cin_blk, cout_blk) > budget:
        if cin_blk > 128:
            cin_blk = max(128, (cin_blk // 2) // 128 * 128)   # MXU-aligned K blocking
        elif cout_blk > 8:
            cout_blk = max(8, (cout_blk // 2) // 8 * 8)
        else:
            # TODO(synk): add a spatial row-band grid axis (manual DMA / element-indexed
            # overlapping windows) so huge Cin x H x W inputs fit VMEM.
            raise NotImplementedError("input too large for the resident-slab conv kernel")

    Cin_p = Cin if cin_blk == Cin else _round_up(Cin, cin_blk)
    Cout_p = _round_up(Cout, cout_blk)

    # v7x has two TensorCores: make sure a single-image call still has >= 2 grid steps.
    if N == 1 and Cout_p == cout_blk and Cin_p == cin_blk and Cout >= 16:
        cout_blk = _round_up((Cout + 1) // 2, 8)
        Cout_p = _round_up(Cout, cout_blk)

    # ---- pad + flatten the input (zero padding), channel-pad if Cin is blocked.
    x_p = jnp.pad(x.astype(dtype),
                  ((0, 0), (0, Cin_p - Cin), (pH, pH + 1), (pW, Wpad - W - pW)))
    x_flat = x_p.reshape(N, Cin_p, Lx)                       # pure row-major reshape

    if Cin_p != Cin or Cout_p != Cout:
        w = jnp.pad(w, ((0, 0), (0, Cout_p - Cout), (0, Cin_p - Cin)))
        bias2d = jnp.pad(bias2d, ((0, Cout_p - Cout), (0, 0)))

    n_co = Cout_p // cout_blk
    n_ci = Cin_p // cin_blk

    kernel = functools.partial(_conv_taps_kernel, kh=kh, kw=kw, dH=dH, dW=dW,
                               Wpad=Wpad, Lout=Lout)

    cost = pl.CostEstimate(
        flops=2 * N * Cout_p * Cin_p * kh * kw * Lout,
        transcendentals=0,
        bytes_accessed=(x_flat.size + w.size + N * Cout_p * Lout) * itemsize
                       + bias2d.size * 4,
    )

    out_flat = pl.pallas_call(
        kernel,
        out_shape=jax.ShapeDtypeStruct((N, Cout_p, Lout), dtype),
        grid_spec=pltpu.PrefetchScalarGridSpec(
            num_scalar_prefetch=0,
            grid=(N, n_co, n_ci),
            in_specs=[
                pl.BlockSpec((1, cin_blk, Lx), lambda n, co, c: (n, c, 0)),
                pl.BlockSpec((kh * kw, cout_blk, cin_blk), lambda n, co, c: (0, co, c)),
                pl.BlockSpec((cout_blk, 1), lambda n, co, c: (co, 0)),
            ],
            out_specs=pl.BlockSpec((1, cout_blk, Lout), lambda n, co, c: (n, co, 0)),
            scratch_shapes=[pltpu.VMEM((cout_blk, Lout), jnp.float32)],
        ),
        compiler_params=pltpu.CompilerParams(
            dimension_semantics=("parallel", "parallel", "arbitrary"),
            vmem_limit_bytes=vmem_limit,
        ),
        cost_estimate=cost,
    )(x_flat, w, bias2d)

    # Dense output -> crop channel padding, un-flatten, apply stride, crop lane padding.
    out = out_flat[:, :Cout, :].reshape(N, Cout, Hd, Wpad)
    if sH != 1 or sW != 1:
        # TODO(synk): strided convs currently pay sH*sW extra compute (dense conv then
        # subsample); a native strided path would stride the tap slices instead.
        out = out[:, :, ::sH, ::sW]
    out = out[:, :, :Hout, :Wout]
    return out.astype(x.dtype)


# ------------------------- Demo / self-check -------------------------

if __name__ == "__main__":
    # Module hyperparameters (small, consistent with Conv2d.__init__)
    c1, c2, k = 4, 8, 3
    r, lora_alpha = 0.5, 1.0
    stride, padding, dilation, groups = (1, 1), (1, 1), (1, 1), 1
    inter_r = max(math.floor(min(k * k, c2 * c1) * r), 1)   # = 4
    scaling = lora_alpha / r

    key = jax.random.PRNGKey(0)
    kx, ka, kb, kbias = jax.random.split(key, 4)

    x = jax.random.normal(kx, (2, c1, 16, 16), dtype=jnp.float32)

    # kaiming_uniform_(a=sqrt(5)) == uniform(-1/sqrt(fan_in), 1/sqrt(fan_in))
    bound_a = 1.0 / math.sqrt(k * k)
    bound_b = 1.0 / math.sqrt(inter_r)
    lora_A = jax.random.uniform(ka, (inter_r, k * k), jnp.float32,
                                minval=-bound_a, maxval=bound_a)
    lora_B = jax.random.uniform(kb, (c2 * c1, inter_r), jnp.float32,
                                minval=-bound_b, maxval=bound_b)
    # NOTE: the reference module leaves bias uninitialized (torch.empty); deterministic init.
    bias = jax.random.uniform(kbias, (c2,), jnp.float32, minval=-0.1, maxval=0.1)

    out = lora_conv2d(x, lora_A, lora_B, bias, k=k, stride=stride,
                      padding=padding, dilation=dilation, groups=groups,
                      scaling=scaling)
    jax.block_until_ready(out)

    # Reference check with XLA conv.  Tolerance covers the MXU's default f32 matmul
    # precision (bf16-pass based) used by both implementations on TPU.
    W_ref = (lora_B @ lora_A).reshape(c2, c1, k, k) * scaling
    ref = jax.lax.conv_general_dilated(
        x, W_ref, window_strides=stride,
        padding=[(padding[0], padding[0]), (padding[1], padding[1])],
        rhs_dilation=dilation,
        dimension_numbers=("NCHW", "OIHW", "NCHW")) + bias.reshape(1, c2, 1, 1)
    assert out.shape == ref.shape == (2, c2, 16, 16), (out.shape, ref.shape)
    max_err = float(jnp.max(jnp.abs(out - ref)))
    assert jnp.allclose(out, ref, atol=1e-2, rtol=1e-2), max_err

    print("KERNEL_OK")
</pallas_src>

<mosaic_0001>
module attributes {stable_mosaic.version = 11 : i64} {
  func.func @_conv_taps_kernel(%arg0: i32, %arg1: i32, %arg2: i32, %arg3: memref<1x4x2432xf32, #tpu.memory_space<vmem>>, %arg4: memref<9x8x4xf32, #tpu.memory_space<vmem>>, %arg5: memref<8x1xf32, #tpu.memory_space<vmem>>, %arg6: memref<1x8x2048xf32, #tpu.memory_space<vmem>>, %arg7: memref<8x2048xf32, #tpu.memory_space<vmem>>) attributes {dimension_semantics = [#tpu.dimension_semantics<parallel>, #tpu.dimension_semantics<parallel>, #tpu.dimension_semantics<arbitrary>], iteration_bounds = array<i64: 2, 1, 1>, scalar_prefetch = 0 : i64, scratch_operands = 1 : i64, tpu.core_type = #tpu.core_type<tc>, window_params = [{transform_indices = @transform_0, window_bounds = array<i64: 1, 4, 2432>}, {transform_indices = @transform_1, window_bounds = array<i64: 9, 8, 4>}, {transform_indices = @transform_2, window_bounds = array<i64: 8, 1>}, {transform_indices = @transform_3, window_bounds = array<i64: 1, 8, 2048>}]} {
    %c0_i32 = arith.constant 0 : i32
    %0 = arith.cmpi eq, %arg2, %c0_i32 : i32
    %1 = arith.extui %0 : i1 to i32
    %c0_i32_0 = arith.constant 0 : i32
    %2 = arith.cmpi ne, %1, %c0_i32_0 : i32
    scf.if %2 {
      %cst_86 = arith.constant 0.000000e+00 : f32
      %78 = vector.broadcast %cst_86 : f32 to vector<8x2048xf32>
      %c0_87 = arith.constant 0 : index
      %c0_88 = arith.constant 0 : index
      %79 = vector.load %arg7[%c0_87, %c0_88] : memref<8x2048xf32, #tpu.memory_space<vmem>>, vector<8x2048xf32>
      tpu.vector_store %arg7[%c0_87, %c0_88], %78 {strides = array<i32>} : memref<8x2048xf32, #tpu.memory_space<vmem>>, vector<8x2048xf32>,
    } else {
    }
    %c0 = arith.constant 0 : index
    %c0_1 = arith.constant 0 : index
    %c0_2 = arith.constant 0 : index
    %3 = vector.load %arg3[%c0, %c0_1, %c0_2] : memref<1x4x2432xf32, #tpu.memory_space<vmem>>, vector<1x4x2048xf32>
    %4 = vector.shape_cast %3 : vector<1x4x2048xf32> to vector<4x2048xf32>
    %c0_3 = arith.constant 0 : index
    %c0_4 = arith.constant 0 : index
    %5 = vector.load %arg7[%c0_3, %c0_4] : memref<8x2048xf32, #tpu.memory_space<vmem>>, vector<8x2048xf32>
    %c0_5 = arith.constant 0 : index
    %c0_6 = arith.constant 0 : index
    %c0_7 = arith.constant 0 : index
    %6 = vector.load %arg4[%c0_5, %c0_6, %c0_7] : memref<9x8x4xf32, #tpu.memory_space<vmem>>, vector<1x8x4xf32>
    %7 = vector.shape_cast %6 : vector<1x8x4xf32> to vector<8x4xf32>
    %cst = arith.constant dense<0.000000e+00> : vector<8x2048xf32>
    %8 = tpu.matmul %7, %4, %cst {dimension_numbers = #tpu.dot_dimension_numbers<[1], [0], [0], [1], [0, 0, 1, 1], [], []>} : vector<8x4xf32>, vector<4x2048xf32>, vector<8x2048xf32> -> vector<8x2048xf32>
    %9 = arith.addf %5, %8 : vector<8x2048xf32>
    %c0_8 = arith.constant 0 : index
    %c0_9 = arith.constant 0 : index
    %10 = vector.load %arg7[%c0_8, %c0_9] : memref<8x2048xf32, #tpu.memory_space<vmem>>, vector<8x2048xf32>
    tpu.vector_store %arg7[%c0_8, %c0_9], %9 {strides = array<i32>} : memref<8x2048xf32, #tpu.memory_space<vmem>>, vector<8x2048xf32>,
    %c0_10 = arith.constant 0 : index
    %c0_11 = arith.constant 0 : index
    %c1 = arith.constant 1 : index
    %11 = vector.load %arg3[%c0_10, %c0_11, %c1] : memref<1x4x2432xf32, #tpu.memory_space<vmem>>, vector<1x4x2048xf32>
    %12 = vector.shape_cast %11 : vector<1x4x2048xf32> to vector<4x2048xf32>
    %c0_12 = arith.constant 0 : index
    %c0_13 = arith.constant 0 : index
    %13 = vector.load %arg7[%c0_12, %c0_13] : memref<8x2048xf32, #tpu.memory_space<vmem>>, vector<8x2048xf32>
    %c1_14 = arith.constant 1 : index
    %c0_15 = arith.constant 0 : index
    %c0_16 = arith.constant 0 : index
    %14 = vector.load %arg4[%c1_14, %c0_15, %c0_16] : memref<9x8x4xf32, #tpu.memory_space<vmem>>, vector<1x8x4xf32>
    %15 = vector.shape_cast %14 : vector<1x8x4xf32> to vector<8x4xf32>
    %cst_17 = arith.constant dense<0.000000e+00> : vector<8x2048xf32>
    %16 = tpu.matmul %15, %12, %cst_17 {dimension_numbers = #tpu.dot_dimension_numbers<[1], [0], [0], [1], [0, 0, 1, 1], [], []>} : vector<8x4xf32>, vector<4x2048xf32>, vector<8x2048xf32> -> vector<8x2048xf32>
    %17 = arith.addf %13, %16 : vector<8x2048xf32>
    %c0_18 = arith.constant 0 : index
    %c0_19 = arith.constant 0 : index
    %18 = vector.load %arg7[%c0_18, %c0_19] : memref<8x2048xf32, #tpu.memory_space<vmem>>, vector<8x2048xf32>
    tpu.vector_store %arg7[%c0_18, %c0_19], %17 {strides = array<i32>} : memref<8x2048xf32, #tpu.memory_space<vmem>>, vector<8x2048xf32>,
    %c0_20 = arith.constant 0 : index
    %c0_21 = arith.constant 0 : index
    %c2 = arith.constant 2 : index
    %19 = vector.load %arg3[%c0_20, %c0_21, %c2] : memref<1x4x2432xf32, #tpu.memory_space<vmem>>, vector<1x4x2048xf32>
    %20 = vector.shape_cast %19 : vector<1x4x2048xf32> to vector<4x2048xf32>
    %c0_22 = arith.constant 0 : index
    %c0_23 = arith.constant 0 : index
    %21 = vector.load %arg7[%c0_22, %c0_23] : memref<8x2048xf32, #tpu.memory_space<vmem>>, vector<8x2048xf32>
    %c2_24 = arith.constant 2 : index
    %c0_25 = arith.constant 0 : index
    %c0_26 = arith.constant 0 : index
    %22 = vector.load %arg4[%c2_24, %c0_25, %c0_26] : memref<9x8x4xf32, #tpu.memory_space<vmem>>, vector<1x8x4xf32>
    %23 = vector.shape_cast %22 : vector<1x8x4xf32> to vector<8x4xf32>
    %cst_27 = arith.constant dense<0.000000e+00> : vector<8x2048xf32>
    %24 = tpu.matmul %23, %20, %cst_27 {dimension_numbers = #tpu.dot_dimension_numbers<[1], [0], [0], [1], [0, 0, 1, 1], [], []>} : vector<8x4xf32>, vector<4x2048xf32>, vector<8x2048xf32> -> vector<8x2048xf32>
    %25 = arith.addf %21, %24 : vector<8x2048xf32>
    %c0_28 = arith.constant 0 : index
    %c0_29 = arith.constant 0 : index
    %26 = vector.load %arg7[%c0_28, %c0_29] : memref<8x2048xf32, #tpu.memory_space<vmem>>, vector<8x2048xf32>
    tpu.vector_store %arg7[%c0_28, %c0_29], %25 {strides = array<i32>} : memref<8x2048xf32, #tpu.memory_space<vmem>>, vector<8x2048xf32>,
    %c0_30 = arith.constant 0 : index
    %c0_31 = arith.constant 0 : index
    %c128 = arith.constant 128 : index
    %27 = vector.load %arg3[%c0_30, %c0_31, %c128] : memref<1x4x2432xf32, #tpu.memory_space<vmem>>, vector<1x4x2048xf32>
    %28 = vector.shape_cast %27 : vector<1x4x2048xf32> to vector<4x2048xf32>
    %c0_32 = arith.constant 0 : index
    %c0_33 = arith.constant 0 : index
    %29 = vector.load %arg7[%c0_32, %c0_33] : memref<8x2048xf32, #tpu.memory_space<vmem>>, vector<8x2048xf32>
    %c3 = arith.constant 3 : index
    %c0_34 = arith.constant 0 : index
    %c0_35 = arith.constant 0 : index
    %30 = vector.load %arg4[%c3, %c0_34, %c0_35] : memref<9x8x4xf32, #tpu.memory_space<vmem>>, vector<1x8x4xf32>
    %31 = vector.shape_cast %30 : vector<1x8x4xf32> to vector<8x4xf32>
    %cst_36 = arith.constant dense<0.000000e+00> : vector<8x2048xf32>
    %32 = tpu.matmul %31, %28, %cst_36 {dimension_numbers = #tpu.dot_dimension_numbers<[1], [0], [0], [1], [0, 0, 1, 1], [], []>} : vector<8x4xf32>, vector<4x2048xf32>, vector<8x2048xf32> -> vector<8x2048xf32>
    %33 = arith.addf %29, %32 : vector<8x2048xf32>
    %c0_37 = arith.constant 0 : index
    %c0_38 = arith.constant 0 : index
    %34 = vector.load %arg7[%c0_37, %c0_38] : memref<8x2048xf32, #tpu.memory_space<vmem>>, vector<8x2048xf32>
    tpu.vector_store %arg7[%c0_37, %c0_38], %33 {strides = array<i32>} : memref<8x2048xf32, #tpu.memory_space<vmem>>, vector<8x2048xf32>,
    %c0_39 = arith.constant 0 : index
    %c0_40 = arith.constant 0 : index
    %c129 = arith.constant 129 : index
    %35 = vector.load %arg3[%c0_39, %c0_40, %c129] : memref<1x4x2432xf32, #tpu.memory_space<vmem>>, vector<1x4x2048xf32>
    %36 = vector.shape_cast %35 : vector<1x4x2048xf32> to vector<4x2048xf32>
    %c0_41 = arith.constant 0 : index
    %c0_42 = arith.constant 0 : index
    %37 = vector.load %arg7[%c0_41, %c0_42] : memref<8x2048xf32, #tpu.memory_space<vmem>>, vector<8x2048xf32>
    %c4 = arith.constant 4 : index
    %c0_43 = arith.constant 0 : index
    %c0_44 = arith.constant 0 : index
    %38 = vector.load %arg4[%c4, %c0_43, %c0_44] : memref<9x8x4xf32, #tpu.memory_space<vmem>>, vector<1x8x4xf32>
    %39 = vector.shape_cast %38 : vector<1x8x4xf32> to vector<8x4xf32>
    %cst_45 = arith.constant dense<0.000000e+00> : vector<8x2048xf32>
    %40 = tpu.matmul %39, %36, %cst_45 {dimension_numbers = #tpu.dot_dimension_numbers<[1], [0], [0], [1], [0, 0, 1, 1], [], []>} : vector<8x4xf32>, vector<4x2048xf32>, vector<8x2048xf32> -> vector<8x2048xf32>
    %41 = arith.addf %37, %40 : vector<8x2048xf32>
    %c0_46 = arith.constant 0 : index
    %c0_47 = arith.constant 0 : index
    %42 = vector.load %arg7[%c0_46, %c0_47] : memref<8x2048xf32, #tpu.memory_space<vmem>>, vector<8x2048xf32>
    tpu.vector_store %arg7[%c0_46, %c0_47], %41 {strides = array<i32>} : memref<8x2048xf32, #tpu.memory_space<vmem>>, vector<8x2048xf32>,
    %c0_48 = arith.constant 0 : index
    %c0_49 = arith.constant 0 : index
    %c130 = arith.constant 130 : index
    %43 = vector.load %arg3[%c0_48, %c0_49, %c130] : memref<1x4x2432xf32, #tpu.memory_space<vmem>>, vector<1x4x2048xf32>
    %44 = vector.shape_cast %43 : vector<1x4x2048xf32> to vector<4x2048xf32>
    %c0_50 = arith.constant 0 : index
    %c0_51 = arith.constant 0 : index
    %45 = vector.load %arg7[%c0_50, %c0_51] : memref<8x2048xf32, #tpu.memory_space<vmem>>, vector<8x2048xf32>
    %c5 = arith.constant 5 : index
    %c0_52 = arith.constant 0 : index
    %c0_53 = arith.constant 0 : index
    %46 = vector.load %arg4[%c5, %c0_52, %c0_53] : memref<9x8x4xf32, #tpu.memory_space<vmem>>, vector<1x8x4xf32>
    %47 = vector.shape_cast %46 : vector<1x8x4xf32> to vector<8x4xf32>
    %cst_54 = arith.constant dense<0.000000e+00> : vector<8x2048xf32>
    %48 = tpu.matmul %47, %44, %cst_54 {dimension_numbers = #tpu.dot_dimension_numbers<[1], [0], [0], [1], [0, 0, 1, 1], [], []>} : vector<8x4xf32>, vector<4x2048xf32>, vector<8x2048xf32> -> vector<8x2048xf32>
    %49 = arith.addf %45, %48 : vector<8x2048xf32>
    %c0_55 = arith.constant 0 : index
    %c0_56 = arith.constant 0 : index
    %50 = vector.load %arg7[%c0_55, %c0_56] : memref<8x2048xf32, #tpu.memory_space<vmem>>, vector<8x2048xf32>
    tpu.vector_store %arg7[%c0_55, %c0_56], %49 {strides = array<i32>} : memref<8x2048xf32, #tpu.memory_space<vmem>>, vector<8x2048xf32>,
    %c0_57 = arith.constant 0 : index
    %c0_58 = arith.constant 0 : index
    %c256 = arith.constant 256 : index
    %51 = vector.load %arg3[%c0_57, %c0_58, %c256] : memref<1x4x2432xf32, #tpu.memory_space<vmem>>, vector<1x4x2048xf32>
    %52 = vector.shape_cast %51 : vector<1x4x2048xf32> to vector<4x2048xf32>
    %c0_59 = arith.constant 0 : index
    %c0_60 = arith.constant 0 : index
    %53 = vector.load %arg7[%c0_59, %c0_60] : memref<8x2048xf32, #tpu.memory_space<vmem>>, vector<8x2048xf32>
    %c6 = arith.constant 6 : index
    %c0_61 = arith.constant 0 : index
    %c0_62 = arith.constant 0 : index
    %54 = vector.load %arg4[%c6, %c0_61, %c0_62] : memref<9x8x4xf32, #tpu.memory_space<vmem>>, vector<1x8x4xf32>
    %55 = vector.shape_cast %54 : vector<1x8x4xf32> to vector<8x4xf32>
    %cst_63 = arith.constant dense<0.000000e+00> : vector<8x2048xf32>
    %56 = tpu.matmul %55, %52, %cst_63 {dimension_numbers = #tpu.dot_dimension_numbers<[1], [0], [0], [1], [0, 0, 1, 1], [], []>} : vector<8x4xf32>, vector<4x2048xf32>, vector<8x2048xf32> -> vector<8x2048xf32>
    %57 = arith.addf %53, %56 : vector<8x2048xf32>
    %c0_64 = arith.constant 0 : index
    %c0_65 = arith.constant 0 : index
    %58 = vector.load %arg7[%c0_64, %c0_65] : memref<8x2048xf32, #tpu.memory_space<vmem>>, vector<8x2048xf32>
    tpu.vector_store %arg7[%c0_64, %c0_65], %57 {strides = array<i32>} : memref<8x2048xf32, #tpu.memory_space<vmem>>, vector<8x2048xf32>,
    %c0_66 = arith.constant 0 : index
    %c0_67 = arith.constant 0 : index
    %c257 = arith.constant 257 : index
    %59 = vector.load %arg3[%c0_66, %c0_67, %c257] : memref<1x4x2432xf32, #tpu.memory_space<vmem>>, vector<1x4x2048xf32>
    %60 = vector.shape_cast %59 : vector<1x4x2048xf32> to vector<4x2048xf32>
    %c0_68 = arith.constant 0 : index
    %c0_69 = arith.constant 0 : index
    %61 = vector.load %arg7[%c0_68, %c0_69] : memref<8x2048xf32, #tpu.memory_space<vmem>>, vector<8x2048xf32>
    %c7 = arith.constant 7 : index
    %c0_70 = arith.constant 0 : index
    %c0_71 = arith.constant 0 : index
    %62 = vector.load %arg4[%c7, %c0_70, %c0_71] : memref<9x8x4xf32, #tpu.memory_space<vmem>>, vector<1x8x4xf32>
    %63 = vector.shape_cast %62 : vector<1x8x4xf32> to vector<8x4xf32>
    %cst_72 = arith.constant dense<0.000000e+00> : vector<8x2048xf32>
    %64 = tpu.matmul %63, %60, %cst_72 {dimension_numbers = #tpu.dot_dimension_numbers<[1], [0], [0], [1], [0, 0, 1, 1], [], []>} : vector<8x4xf32>, vector<4x2048xf32>, vector<8x2048xf32> -> vector<8x2048xf32>
    %65 = arith.addf %61, %64 : vector<8x2048xf32>
    %c0_73 = arith.constant 0 : index
    %c0_74 = arith.constant 0 : index
    %66 = vector.load %arg7[%c0_73, %c0_74] : memref<8x2048xf32, #tpu.memory_space<vmem>>, vector<8x2048xf32>
    tpu.vector_store %arg7[%c0_73, %c0_74], %65 {strides = array<i32>} : memref<8x2048xf32, #tpu.memory_space<vmem>>, vector<8x2048xf32>,
    %c0_75 = arith.constant 0 : index
    %c0_76 = arith.constant 0 : index
    %c258 = arith.constant 258 : index
    %67 = vector.load %arg3[%c0_75, %c0_76, %c258] : memref<1x4x2432xf32, #tpu.memory_space<vmem>>, vector<1x4x2048xf32>
    %68 = vector.shape_cast %67 : vector<1x4x2048xf32> to vector<4x2048xf32>
    %c0_77 = arith.constant 0 : index
    %c0_78 = arith.constant 0 : index
    %69 = vector.load %arg7[%c0_77, %c0_78] : memref<8x2048xf32, #tpu.memory_space<vmem>>, vector<8x2048xf32>
    %c8 = arith.constant 8 : index
    %c0_79 = arith.constant 0 : index
    %c0_80 = arith.constant 0 : index
    %70 = vector.load %arg4[%c8, %c0_79, %c0_80] : memref<9x8x4xf32, #tpu.memory_space<vmem>>, vector<1x8x4xf32>
    %71 = vector.shape_cast %70 : vector<1x8x4xf32> to vector<8x4xf32>
    %cst_81 = arith.constant dense<0.000000e+00> : vector<8x2048xf32>
    %72 = tpu.matmul %71, %68, %cst_81 {dimension_numbers = #tpu.dot_dimension_numbers<[1], [0], [0], [1], [0, 0, 1, 1], [], []>} : vector<8x4xf32>, vector<4x2048xf32>, vector<8x2048xf32> -> vector<8x2048xf32>
    %73 = arith.addf %69, %72 : vector<8x2048xf32>
    %c0_82 = arith.constant 0 : index
    %c0_83 = arith.constant 0 : index
    %74 = vector.load %arg7[%c0_82, %c0_83] : memref<8x2048xf32, #tpu.memory_space<vmem>>, vector<8x2048xf32>
    tpu.vector_store %arg7[%c0_82, %c0_83], %73 {strides = array<i32>} : memref<8x2048xf32, #tpu.memory_space<vmem>>, vector<8x2048xf32>,
    %c0_i32_84 = arith.constant 0 : i32
    %75 = arith.cmpi eq, %arg2, %c0_i32_84 : i32
    %76 = arith.extui %75 : i1 to i32
    %c0_i32_85 = arith.constant 0 : i32
    %77 = arith.cmpi ne, %76, %c0_i32_85 : i32
    scf.if %77 {
      %c0_86 = arith.constant 0 : index
      %c0_87 = arith.constant 0 : index
      %78 = vector.load %arg7[%c0_86, %c0_87] : memref<8x2048xf32, #tpu.memory_space<vmem>>, vector<8x2048xf32>
      %c0_88 = arith.constant 0 : index
      %c0_89 = arith.constant 0 : index
      %79 = vector.load %arg5[%c0_88, %c0_89] : memref<8x1xf32, #tpu.memory_space<vmem>>, vector<8x1xf32>
      %80 = vector.broadcast %79 : vector<8x1xf32> to vector<8x2048xf32>
      %81 = arith.addf %78, %80 : vector<8x2048xf32>
      %c0_90 = arith.constant 0 : index
      %c0_91 = arith.constant 0 : index
      %c0_92 = arith.constant 0 : index
      %82 = vector.load %arg6[%c0_90, %c0_91, %c0_92] : memref<1x8x2048xf32, #tpu.memory_space<vmem>>, vector<1x8x2048xf32>
      %83 = vector.shape_cast %82 : vector<1x8x2048xf32> to vector<8x2048xf32>
      %84 = vector.shape_cast %81 : vector<8x2048xf32> to vector<1x8x2048xf32>
      tpu.vector_store %arg6[%c0_90, %c0_91, %c0_92], %84 {strides = array<i32>} : memref<1x8x2048xf32, #tpu.memory_space<vmem>>, vector<1x8x2048xf32>,
    } else {
    }
    return
  }
  func.func @transform_0(%arg0: i32, %arg1: i32, %arg2: i32) -> (i32, i32, i32) {
    %c0_i32 = arith.constant 0 : i32
    %c0_i32_0 = arith.constant 0 : i32
    return %arg0, %arg2, %c0_i32 : i32, i32, i32
  }
  func.func @transform_1(%arg0: i32, %arg1: i32, %arg2: i32) -> (i32, i32, i32) {
    %c0_i32 = arith.constant 0 : i32
    %c0_i32_0 = arith.constant 0 : i32
    return %c0_i32, %arg1, %arg2 : i32, i32, i32
  }
  func.func @transform_2(%arg0: i32, %arg1: i32, %arg2: i32) -> (i32, i32) {
    %c0_i32 = arith.constant 0 : i32
    %c0_i32_0 = arith.constant 0 : i32
    return %arg1, %c0_i32 : i32, i32
  }
  func.func @transform_3(%arg0: i32, %arg1: i32, %arg2: i32) -> (i32, i32, i32) {
    %c0_i32 = arith.constant 0 : i32
    %c0_i32_0 = arith.constant 0 : i32
    return %arg0, %arg1, %c0_i32 : i32, i32, i32
  }
}

</mosaic_0001>

<bundles_post_ra>
// kernel: tpu_custom_call.1
= control target key start
LH: loop header
LB: loop body
LE: loop exit
PB: predicated region body
PF: predicated region fallthrough
CT: control target
= control target key end

     0   :  { %8 = vsyncpa [#allocation4], 0  ;;  %s6994_s0 = inlined_call_operand.hbm [shape: f32[2,4,2432], index: 0, kind: input, shape index: {}]   ;;  %s6995_s1 = inlined_call_operand.vmem [shape: f32[9,8,4], index: 1, kind: input, shape index: {}]   ;;  %s6996_s2 = inlined_call_operand.vmem [shape: f32[8,1], index: 2, kind: input, shape index: {}]   ;;  %s6997_s3 = inlined_call_operand.hbm [shape: f32[2,8,2048], index: 3, kind: output, shape index: {}]  }
   0x1   :  { %10 = vsyncpa [#allocation4 + $0x1], 0 }
   0x2   :  { %11 = vsyncpa [#allocation5], 0 }
   0x3   :  { %13 = vsyncpa [#allocation5 + $0x1], 0  ;;  %s5351_s12 = smov 0   ;;  %s5353_s13 = smov 0  }
   0x4   :  { %s5355_s14 = smov 0   ;;  %s5357_s15 = smov 0  }
   0x5   :  { %s5359_s16 = smov 0   ;;  %s5361_s17 = smov 0  }
   0x6 LB: > { %s4834_s18 = sadd.s32 4294967295, %s5326_s17   ;;  %s4835_s19 = sadd.s32 4294967294, %s5326_s17   ;;  %s5326_s17 = sphi %s5361_s17, %s19_s17   ;;  %s5322_s16 = sphi %s5359_s16, %s7018_s16   ;;  %s5318_s15 = sphi %s5357_s15, %s7017_s15   ;;  %s5314_s14 = sphi %s5355_s14, %s7016_s14   ;;  %s5310_s13 = sphi %s5353_s13, %s7015_s13   ;;  %s5306_s12 = sphi %s5351_s12, %s7014_s12  }
   0x7   : > { %s38_s20 = sadd.s32 1, %s5322_s16  ;;  %s47_s21 = sadd.s32 1, %s5314_s14 }
   0x8   : > { %p40_p0 = scmp.ge.s32.totalorder %s38_s20, 2  ;;  %p54_p1 = scmp.ne.s32.totalorder %s5314_s14, %s5310_s13 }
   0x9   : > { %p55_p2 = scmp.eq.s32.totalorder %s5326_s17, 0  ;;  %p60_p3 = scmp.ne.s32.totalorder %s5310_s13, %s5306_s12 }
   0xa   : > { %s7020_s20 = smov (%p40_p0, %s38_s20), 0  ;;  %p61_p5 = scmp.eq.s32.totalorder %s4834_s18, 0 }
   0xb   : > { %p5392_p4 = por %p55_p2, %p54_p1  ;;  %s42_s23 = ssub.s32 %s5322_s16, %s7020_s20 }
   0xc   : > { %p140_p6 = scmp.eq.s32.totalorder %s4834_s18, 1  ;;  %p45_p7 = scmp.eq.s32.totalorder %s42_s23, 0 }
   0xd   : > { %p5398_p8 = por %p61_p5, %p60_p3  ;;  %p146_p10 = scmp.eq.s32.totalorder %s4835_s19, 1 }
   0xe   : > { %p5402_p9 = por %p140_p6, %p54_p1  ;;  %p4839_p12 = scmp.ge.s32.totalorder %s5326_s17, 2 }
   0xf   : > { %s5407_s26 = scalar_select %p45_p7, %s5314_s14, %s47_s21  }
  0x10   : > { %p5409_p11 = por %p146_p10, %p60_p3  ;;  %p5160_p13 = scmp.lt.s32.totalorder %s5326_s17, 2 }
  0x11   : > { %s183_s28 = sand.u32 1, %s5314_s14   ;;  %s5146_s30 = smul.u32 76, %s5322_s16 }
  0x12   : > { %s5145_s29 = smul.u32 76, %s183_s28  ;;  %p5153_p0 = pnand %p5160_p13, %p5392_p4 }
  0x13   : > { %p4841_p2 = scmp.ge.s32.totalorder %s5326_s17, 1  ;;  %s194_s6 = scalar_lea.hbm %s6994_s0, %s5146_s30 }
  0x14   : > { %s187_s7 = scalar_lea.vmem [#allocation3], %s5145_s29  ;;  %s196_s9 = sshll.u32 %s194_s6, 4  ;;  %s197_s9 = int_to_ptr.hbm [resolvable:$true] %s196_s9 }
  0x15   : > { %s198_s8 = sshll.u32 %s187_s7, 4  ;;  %s184_s10 = scalar_lea.sflag [#allocation4], %s183_s28  ;;  %s199_s8 = int_to_ptr.vmem [resolvable:$true] %s198_s8 }
  0x16   : > { %5155 = dma.hbm_to_vmem [thread:$0]  (!%p5153_p0), %s197_s9, 1216, %s199_s8, %s184_s10  }
  0x17   : > { %p203_p1 = scmp.lt.s32.totalorder %s5326_s17, 3 }
  0x19   : > { %p204_p3 = pnand %p4841_p2, %p203_p1 }
  0x1b   : > { %207 = sbr.rel (%p204_p3) target bundleno = 596 (0x254), region = 32 }
  0x20   : > { %s5425_s11 = sand.u32 1, %s5310_s13  }
  0x21   : > { %s5147_s18 = smul.u32 76, %s5425_s11  ;;  %s210_s19 = scalar_lea.sflag [#allocation4], %s5425_s11 }
  0x23   : > { %s5429_s21 = scalar_lea.vmem [#allocation3], %s5147_s18 }
  0x24   : > { %5297 = dma.done.wait (%p5398_p8), %s210_s19, 1216  }
  0x25   : > { %5299 = vsyncadd (%p5398_p8), %s210_s19, 4294966080  ;;  %v5436_v0 = vld [vmem:[%s5429_s21 + $0x10] sm:$0xff]  ;;  %v5439_v1 = vld [vmem:[%s5429_s21 + $0x8] sm:$0xff]  ;;  %s5328_s22 = smov 127   ;;  %s5329_s23 = smov 126   ;;  %vm343_vm0 = vcmask 1043456  }
  0x26   : > { %316 = vst [vmem:[#allocation1 + $0x20] ss:$2 sm:$0xff] %v5436_v0  ;;  %v5443_v2 = vld [vmem:[%s5429_s21] sm:$0xff]  ;;  %v5447_v3 = vld [vmem:[%s5429_s21 + $0x18] sm:$0xff]  ;;  %v5452_v4 = vld [vmem:[%s5429_s21 + $0x30] sm:$0xff]  ;;  %vm339_vm1 = vcmask 31744  }
  0x27   : > { %314 = vst [vmem:[#allocation1 + $0x10] ss:$2 sm:$0xff] %v5439_v1  ;;  %v5455_v5 = vld [vmem:[%s5429_s21 + $0x28] sm:$0xff]  ;;  %v5465_v9 = vld [vmem:[%s5429_s21 + $0x20] sm:$0xff]  ;;  %v5475_v13 = vld [vmem:[%s5429_s21 + $0x38] sm:$0xff]  ;;  %vm827_vm2 = vcmask 1039360  }
  0x28   : > { %312 = vst [vmem:[#allocation1] ss:$2 sm:$0xff] %v5443_v2  ;;  %v736_v34 = vld [vmem:[%s5429_s21 + $0x40] sm:$0xf]  ;;  %v5541_v52 = vld [vmem:[%s5429_s21 + $0xc] sm:$0xff]  ;;  %v5557_v58 = vld [vmem:[%s5429_s21 + $0x4] sm:$0xff] }
  0x29   : > { %318 = vst [vmem:[#allocation1 + $0x30] ss:$2 sm:$0xff] %v5447_v3  ;;  %v1239_v53 = vld [vmem:[%s5429_s21 + $0x40] sm:$0xf]  ;;  %v5554_v57 = vld [vmem:[%s5429_s21 + $0x2c] sm:$0xff]  ;;  %v5567_v62 = vld [vmem:[%s5429_s21 + $0x14] sm:$0xff] }
  0x2a   : > { %vm1330_vm3 = vcmask 1031168   ;;  %s4842_s4 = sshll.u32 %s5425_s11, 7  ;;  %s5144_s6 = sshll.u32 %s5318_s15, 7 }
  0x2b   : > { %s6901_s5 = scalar_lea.vmem [#allocation6], %s4842_s4  ;;  %s4709_s8 = scalar_lea.hbm %s6997_s3, %s5144_s6 }
  0x2c   : > { %s4711_s9 = sshll.u32 %s6901_s5, 4  ;;  %s4713_s10 = sshll.u32 %s4709_s8, 4  ;;  %s4712_s9 = int_to_ptr.vmem [resolvable:$true] %s4711_s9  ;;  %s4714_s10 = int_to_ptr.hbm [resolvable:$true] %s4713_s10 }
  0x2d   : > { %v5457_v6 = vld.sshfl [vmem:[#allocation1 + $0x20] sm:$0xff pattern:$0x75316420]  ;;  %v5459_v7 = vld.sshfl [vmem:[#allocation1 + $0x28] sm:$0xff pattern:$0x75316420] }
  0x2e   : > { %329 = vst [vmem:[#allocation1 + $0x20] ss:$2 sm:$0xff] %v5452_v4  ;;  %v5462_v8 = vld.sshfl [vmem:[#allocation1 + $0x10] sm:$0xff pattern:$0x75316420]  ;;  %s4696_s18 = scalar_lea.sflag [#allocation5], %s5425_s11 }
  0x2f   : > { %v5467_v10 = vld.sshfl [vmem:[#allocation1 + $0x18] sm:$0xff pattern:$0x75316420]  ;;  %v5469_v11 = vld.sshfl [vmem:[#allocation1] sm:$0xff pattern:$0x75316420]  ;;  %4847 = vmatpush.msk.msra.mxu2 %vm343_vm0, %v5462_v8 }
  0x30   : > { %328 = vst [vmem:[#allocation1 + $0x10] ss:$2 sm:$0xff] %v5455_v5  ;;  %v5472_v12 = vld.sshfl [vmem:[#allocation1 + $0x8] sm:$0xff pattern:$0x75316420]  ;;  %4843 = vmatpush.msk.msra.mxu0 %vm343_vm0, %v5469_v11  ;;  %4849 = vmatpush.msk.msra.mxu3 %vm343_vm0, %v5467_v10  ;;  %s5258_s19 = sshra.s32 %s4714_s10, 4  ;;  %s5259_s19 = int_to_ptr.hbm [resolvable:$true] %s5258_s19 }
  0x31   : > { %327 = vst [vmem:[#allocation1] ss:$2 sm:$0xff] %v5465_v9  ;;  %v5478_v14 = vld.sshfl [vmem:[#allocation1 + $0x30] sm:$0xff pattern:$0x75316420]  ;;  %4845 = vmatpush.msk.msra.mxu1 %vm343_vm0, %v5472_v12  ;;  %s5264_s24 = scalar_lea.hbm %s6997_s3, 256  ;;  %p5265_p7 = scmp.lt.s32.totalorder %s5259_s19, %s6997_s3 }
  0x32   : > { %v5480_v15 = vld.sshfl [vmem:[#allocation1 + $0x38] sm:$0xff pattern:$0x75316420]  ;;  %4851 = vmatpush.msk.msrb.mxu0 %vm343_vm0, %v5457_v6  ;;  %4855 = vmatpush.msk.msrb.mxu2 %vm343_vm0, %v5478_v14 }
  0x33   : > { %330 = vst [vmem:[#allocation1 + $0x30] ss:$2 sm:$0xff] %v5475_v13  ;;  %4853 = vmatpush.msk.msrb.mxu1 %vm343_vm0, %v5459_v7  ;;  %4857 = vmatpush.msk.msrb.mxu3 %vm343_vm0, %v5480_v15 }
  0x35   : > { %v5483_v16 = vld.sshfl [vmem:[#allocation1 + $0x20] sm:$0xff pattern:$0x75316420]  ;;  %v5485_v17 = vld.sshfl [vmem:[#allocation1 + $0x28] sm:$0xff pattern:$0x75316420] }
  0x36   : > { %768 = vst [vmem:[#allocation1 + $0x20] ss:$2 sm:$0xff] %v5436_v0 }
  0x37   : > { %v5488_v18 = vld.sshfl [vmem:[#allocation1 + $0x10] sm:$0xff pattern:$0x75316420]  ;;  %v5490_v19 = vld.sshfl [vmem:[#allocation1 + $0x18] sm:$0xff pattern:$0x75316420] }
  0x38   : > { %766 = vst [vmem:[#allocation1 + $0x10] ss:$2 sm:$0xff] %v5439_v1  ;;  %v5493_v20 = vld.sshfl [vmem:[#allocation1] sm:$0xff pattern:$0x75316420] }
  0x39   : > { %v5495_v21 = vld.sshfl [vmem:[#allocation1 + $0x8] sm:$0xff pattern:$0x75316420] }
  0x3a   : > { %764 = vst [vmem:[#allocation1] ss:$2 sm:$0xff] %v5443_v2  ;;  %v5498_v22 = vld.sshfl [vmem:[#allocation1 + $0x30] sm:$0xff pattern:$0x75316420] }
  0x3b   : > { %v5500_v23 = vld.sshfl [vmem:[#allocation1 + $0x38] sm:$0xff pattern:$0x75316420] }
  0x3c   : > { %770 = vst [vmem:[#allocation1 + $0x30] ss:$2 sm:$0xff] %v5447_v3 }
  0x3d   : > { %v775_v24 = vld.sshfl [vmem:[#allocation1 + $0x20] sm:$0xff pattern:$0x75316420]  ;;  %v776_v25 = vld.sshfl [vmem:[#allocation1 + $0x28] sm:$0xff pattern:$0x75316420] }
  0x3e   : > { %801 = vrot.lane.b32.xlu1 %v775_v24, %s5328_s22  ;;  %781 = vst [vmem:[#allocation1 + $0x20] ss:$2 sm:$0xff] %v5452_v4 }
  0x3f   : > { %v773_v26 = vld.sshfl [vmem:[#allocation1 + $0x10] sm:$0xff pattern:$0x75316420]  ;;  %v774_v27 = vld.sshfl [vmem:[#allocation1 + $0x18] sm:$0xff pattern:$0x75316420] }
  0x40   : > { %797 = vrot.lane.b32.xlu0 %v773_v26, %s5328_s22  ;;  %780 = vst [vmem:[#allocation1 + $0x10] ss:$2 sm:$0xff] %v5455_v5  ;;  %v5586_v26 = vld [vmem:[%s5429_s21 + $0x24] sm:$0xff] }
  0x41   : > { %v771_v28 = vld.sshfl [vmem:[#allocation1] sm:$0xff pattern:$0x75316420]  ;;  %v772_v29 = vld.sshfl [vmem:[#allocation1 + $0x8] sm:$0xff pattern:$0x75316420] }
  0x42   : > { %795 = vrot.lane.b32.xlu2 %v772_v29, %s5328_s22  ;;  %779 = vst [vmem:[#allocation1] ss:$2 sm:$0xff] %v5465_v9  ;;  %v5594_v29 = vld [vmem:[%s5429_s21 + $0x3c] sm:$0xff] }
  0x43   : > { %v778_v30 = vld.sshfl [vmem:[#allocation1 + $0x38] sm:$0xff pattern:$0x75316420]  ;;  %v777_v31 = vld.sshfl [vmem:[#allocation1 + $0x30] sm:$0xff pattern:$0x75316420] }
  0x44   : > { %782 = vst [vmem:[#allocation1 + $0x30] ss:$2 sm:$0xff] %v5475_v13 }
  0x45   : > { %v787_v32 = vld.sshfl [vmem:[#allocation1 + $0x20] sm:$0xff pattern:$0x75316420]  ;;  %v788_v33 = vld.sshfl [vmem:[#allocation1 + $0x28] sm:$0xff pattern:$0x75316420] }
  0x46   : > { %793 = vrot.lane.b32.xlu1 %v771_v28, %s5328_s22  ;;  %1271 = vst [vmem:[#allocation1 + $0x20] ss:$2 sm:$0xff] %v5436_v0 }
  0x47   : > { %v785_v35 = vld.sshfl [vmem:[#allocation1 + $0x10] sm:$0xff pattern:$0x75316420]  ;;  %v786_v36 = vld.sshfl [vmem:[#allocation1 + $0x18] sm:$0xff pattern:$0x75316420] }
  0x48   : > { %799 = vrot.lane.b32.xlu0 %v774_v27, %s5328_s22  ;;  %1269 = vst [vmem:[#allocation1 + $0x10] ss:$2 sm:$0xff] %v5439_v1 }
  0x49   : > { %v783_v37 = vld.sshfl [vmem:[#allocation1] sm:$0xff pattern:$0x75316420]  ;;  %v784_v38 = vld.sshfl [vmem:[#allocation1 + $0x8] sm:$0xff pattern:$0x75316420] }
  0x4a   : > { %805 = vrot.lane.b32.xlu2 %v777_v31, %s5328_s22  ;;  %791 = vst [vmem:[#allocation1] ss:$2 sm:$0xff] %v736_v34  ;;  %v5600_v31 = vld [vmem:[%s5429_s21 + $0x34] sm:$0xff] }
  0x4b   : > { %v789_v39 = vld.sshfl [vmem:[#allocation1 + $0x30] sm:$0xff pattern:$0x75316420]  ;;  %v790_v40 = vld.sshfl [vmem:[#allocation1 + $0x38] sm:$0xff pattern:$0x75316420] }
  0x4c   : > { %1273 = vst [vmem:[#allocation1 + $0x30] ss:$2 sm:$0xff] %v5447_v3 }
  0x4d   : > { %v1278_v44 = vld.sshfl [vmem:[#allocation1 + $0x20] sm:$0xff pattern:$0x75316420]  ;;  %v5524_v45 = vld.sshfl [vmem:[#allocation1 + $0x28] sm:$0xff pattern:$0x75316420] }
  0x4e   : > { %809 = vrot.lane.b32.xlu1 %v783_v37, %s5328_s22  ;;  %1284 = vst [vmem:[#allocation1 + $0x20] ss:$2 sm:$0xff] %v5452_v4 }
  0x4f   : > { %v1277_v41 = vld.sshfl [vmem:[#allocation1 + $0x18] sm:$0xff pattern:$0x75316420]  ;;  %v1276_v42 = vld.sshfl [vmem:[#allocation1 + $0x10] sm:$0xff pattern:$0x75316420] }
  0x50   : > { %807 = vrot.lane.b32.xlu0 %v778_v30, %s5328_s22  ;;  %1283 = vst [vmem:[#allocation1 + $0x10] ss:$2 sm:$0xff] %v5455_v5 }
  0x51   : > { %v792_v43 = vld.sshfl [vmem:[#allocation1] sm:$0xff pattern:$0x75316420] }
  0x52   : > { %803 = vrot.lane.b32.xlu2 %v776_v25, %s5328_s22  ;;  %1267 = vst [vmem:[#allocation1] ss:$2 sm:$0xff] %v5443_v2  ;;  %v5581_v25 = vld [vmem:[%s5429_s21 + $0x1c] sm:$0xff] }
  0x53   : > { %v1280_v48 = vld.sshfl [vmem:[#allocation1 + $0x30] sm:$0xff pattern:$0x75316420]  ;;  %v1281_v49 = vld.sshfl [vmem:[#allocation1 + $0x38] sm:$0xff pattern:$0x75316420] }
  0x54   : > { %1285 = vst [vmem:[#allocation1 + $0x30] ss:$2 sm:$0xff] %v5475_v13 }
  0x55   : > { %v5551_v56 = vld.sshfl [vmem:[#allocation1 + $0x20] sm:$0xff pattern:$0x75316420]  ;;  %v5562_v60 = vld.sshfl [vmem:[#allocation1 + $0x28] sm:$0xff pattern:$0x75316420] }
  0x56   : > { %815 = vrot.lane.b32.xlu1 %v786_v36, %s5328_s22  ;;  %1772 = vst [vmem:[#allocation1 + $0x20] ss:$2 sm:$0xff] %v5567_v62 }
  0x57   : > { %v5535_v50 = vld.sshfl [vmem:[#allocation1 + $0x18] sm:$0xff pattern:$0x75316420]  ;;  %v5537_v51 = vld.sshfl [vmem:[#allocation1 + $0x10] sm:$0xff pattern:$0x75316420] }
  0x58   : > { %813 = vrot.lane.b32.xlu0 %v785_v35, %s5328_s22  ;;  %1770 = vst [vmem:[#allocation1 + $0x10] ss:$2 sm:$0xff] %v5541_v52  ;;  %v5617_v35 = vld [vmem:[%s6995_s1] sm:$0xff] }
  0x59   : > { %v5526_v46 = vld.sshfl [vmem:[#allocation1 + $0x8] sm:$0xff pattern:$0x75316420]  ;;  %v5528_v47 = vld.sshfl [vmem:[#allocation1] sm:$0xff pattern:$0x75316420]  ;;  %4846 = vmatmul.msk.f32.vlgmr.msra.gmra.mxu1 %vm339_vm1, %v5617_v35  ;;  %4844 = vmatmul.msk.f32.vlgmr.msra.gmra.mxu0 %vm339_vm1, %v5617_v35 }
  0x5a   : > { %817 = vrot.lane.b32.xlu2 %v787_v32, %s5328_s22  ;;  %1282 = vst [vmem:[#allocation1] ss:$2 sm:$0xff] %v5465_v9  ;;  %4848 = vmatmul.msk.f32.vlgmr.msra.gmra.mxu2 %vm339_vm1, %v5617_v35 }
  0x5b   : > { %v5574_v2 = vld.sshfl [vmem:[#allocation1 + $0x38] sm:$0xff pattern:$0x75316420]  ;;  %v5578_v24 = vld.sshfl [vmem:[#allocation1 + $0x30] sm:$0xff pattern:$0x75316420]  ;;  %4850 = vmatmul.msk.f32.vlgmr.msra.gmra.mxu3 %vm339_vm1, %v5617_v35  ;;  %4861 = vmatpush.msk.msra.mxu1 %vm343_vm0, %v5495_v21 }
  0x5c   : > { %1774 = vst [vmem:[#allocation1 + $0x30] ss:$2 sm:$0xff] %v5581_v25  ;;  %4863 = vmatpush.msk.msra.mxu2 %vm343_vm0, %v5488_v18  ;;  %4865 = vmatpush.msk.msra.mxu3 %vm343_vm0, %v5490_v19 }
  0x5d   : > { %v5607_v34 = vld.sshfl [vmem:[#allocation1 + $0x28] sm:$0xff pattern:$0x75316420]  ;;  %4859 = vmatpush.msk.msra.mxu0 %vm343_vm0, %v5493_v20 }
  0x5e   : > { %821 = vrot.lane.b32.xlu1 %v789_v39, %s5328_s22 }
  0x5f   : > { %v5560_v59 = vld.sshfl [vmem:[#allocation1 + $0x10] sm:$0xff pattern:$0x75316420]  ;;  %v5564_v61 = vld.sshfl [vmem:[#allocation1 + $0x18] sm:$0xff pattern:$0x75316420] }
  0x60   : > { %811 = vrot.lane.b32.xlu0 %v784_v38, %s5328_s22  ;;  %1784 = vst [vmem:[#allocation1 + $0x10] ss:$2 sm:$0xff] %v5554_v57  ;;  %v2190_v38 = vld [vmem:[%s5429_s21 + $0x44] sm:$0xf] }
  0x61   : > { %v5544_v54 = vld.sshfl [vmem:[#allocation1] sm:$0xff pattern:$0x75316420]  ;;  %v5548_v55 = vld.sshfl [vmem:[#allocation1 + $0x8] sm:$0xff pattern:$0x75316420]  ;;  %4854 = vmatmul.msk.f32.vlgmr.msrb.gmra.mxu1 %vm339_vm1, %v5617_v35  ;;  %4852 = vmatmul.msk.f32.vlgmr.msrb.gmra.mxu0 %vm339_vm1, %v5617_v35 }
  0x62   : > { %823 = vrot.lane.b32.xlu2 %v790_v40, %s5328_s22  ;;  %1294 = vst [vmem:[#allocation1] ss:$2 sm:$0xff] %v1239_v53  ;;  %4869 = vmatpush.msk.msrb.mxu1 %vm343_vm0, %v5485_v17 }
  0x63   : > { %v5620_v36 = vld.sshfl [vmem:[#allocation1 + $0x30] sm:$0xff pattern:$0x75316420]  ;;  %v5622_v37 = vld.sshfl [vmem:[#allocation1 + $0x38] sm:$0xff pattern:$0x75316420]  ;;  %4856 = vmatmul.msk.f32.vlgmr.msrb.gmra.mxu2 %vm339_vm1, %v5617_v35  ;;  %4858 = vmatmul.msk.f32.vlgmr.msrb.gmra.mxu3 %vm339_vm1, %v5617_v35 }
  0x64   : > { %1786 = vst [vmem:[#allocation1 + $0x30] ss:$2 sm:$0xff] %v5594_v29  ;;  %4871 = vmatpush.msk.msrb.mxu2 %vm343_vm0, %v5498_v22  ;;  %4873 = vmatpush.msk.msrb.mxu3 %vm343_vm0, %v5500_v23 }
  0x65   : > { %4867 = vmatpush.msk.msrb.mxu0 %vm343_vm0, %v5483_v16 }
  0x66   : > { %819 = vrot.lane.b32.xlu1 %v788_v33, %s5328_s22  ;;  %v5604_v33 = vld.sshfl [vmem:[#allocation1 + $0x20] sm:$0xff pattern:$0x75316420] }
  0x67   : > { %v5588_v27 = vld.sshfl [vmem:[#allocation1 + $0x10] sm:$0xff pattern:$0x75316420]  ;;  %v5590_v28 = vld.sshfl [vmem:[#allocation1 + $0x18] sm:$0xff pattern:$0x75316420] }
  0x68   : > { %825 = vrot.lane.b32.xlu0 %v792_v43, %s5328_s22  ;;  %2220 = vst [vmem:[#allocation1 + $0x10] ss:$2 sm:$0xff] %v5541_v52 }
  0x69   : > { %v5571_v63 = vld.sshfl [vmem:[#allocation1] sm:$0xff pattern:$0x75316420]  ;;  %1785 = vst [vmem:[#allocation1 + $0x20] ss:$2 sm:$0xff] %v5600_v31  ;;  %4862 = vmatmul.msk.f32.vlgmr.msra.gmra.mxu1 %vm339_vm1, %v5617_v35  ;;  %4860 = vmatmul.msk.f32.vlgmr.msra.gmra.mxu0 %vm339_vm1, %v5617_v35 }
  0x6a   : > { %1300 = vrot.lane.b32.xlu2 %v1276_v42, %s5329_s23  ;;  %1768 = vst [vmem:[#allocation1] ss:$2 sm:$0xff] %v5557_v58 }
  0x6b   : > { %v5666_v6 = vld.sshfl [vmem:[#allocation1 + $0x30] sm:$0xff pattern:$0x75316420]  ;;  %v5668_v7 = vld.sshfl [vmem:[#allocation1 + $0x38] sm:$0xff pattern:$0x75316420]  ;;  %4864 = vmatmul.msk.f32.vlgmr.msra.gmra.mxu2 %vm339_vm1, %v5617_v35  ;;  %4866 = vmatmul.msk.f32.vlgmr.msra.gmra.mxu3 %vm339_vm1, %v5617_v35 }
  0x6c   : > { %2224 = vst [vmem:[#allocation1 + $0x30] ss:$2 sm:$0xff] %v5581_v25 }
  0x6e   : > { %1304 = vrot.lane.b32.xlu1 %v1278_v44, %s5329_s23 }
  0x6f   : > { %v2227_v14 = vld.sshfl [vmem:[#allocation1 + $0x10] sm:$0xff pattern:$0x75316420]  ;;  %v2228_v17 = vld.sshfl [vmem:[#allocation1 + $0x18] sm:$0xff pattern:$0x75316420] }
  0x70   : > { %1302 = vrot.lane.b32.xlu0 %v1277_v41, %s5329_s23  ;;  %v5651_v11 = vld.sshfl [vmem:[#allocation1 + $0x20] sm:$0xff pattern:$0x75316420]  ;;  %v5653_v12 = vld.sshfl [vmem:[#allocation1 + $0x28] sm:$0xff pattern:$0x75316420] }
  0x71   : > { %v5597_v30 = vld.sshfl [vmem:[#allocation1] sm:$0xff pattern:$0x75316420]  ;;  %v5602_v32 = vld.sshfl [vmem:[#allocation1 + $0x8] sm:$0xff pattern:$0x75316420]  ;;  %4870 = vmatmul.msk.f32.vlgmr.msrb.gmra.mxu1 %vm339_vm1, %v5617_v35  ;;  %4868 = vmatmul.msk.f32.vlgmr.msrb.gmra.mxu0 %vm339_vm1, %v5617_v35 }
  0x72   : > { %1310 = vrot.lane.b32.xlu2 %v1281_v49, %s5329_s23  ;;  %1783 = vst [vmem:[#allocation1] ss:$2 sm:$0xff] %v5586_v26 }
  0x73   : > { %2222 = vst [vmem:[#allocation1 + $0x20] ss:$2 sm:$0xff] %v5567_v62  ;;  %v2231_v19 = vld.sshfl [vmem:[#allocation1 + $0x30] sm:$0xff pattern:$0x75316420]  ;;  %4872 = vmatmul.msk.f32.vlgmr.msrb.gmra.mxu2 %vm339_vm1, %v5617_v35  ;;  %4874 = vmatmul.msk.f32.vlgmr.msrb.gmra.mxu3 %vm339_vm1, %v5617_v35 }
  0x74   : > { %2234 = vst [vmem:[#allocation1 + $0x10] ss:$2 sm:$0xff] %v5554_v57  ;;  %v2232_v16 = vld.sshfl [vmem:[#allocation1 + $0x38] sm:$0xff pattern:$0x75316420] }
  0x75   : > { %2236 = vst [vmem:[#allocation1 + $0x30] ss:$2 sm:$0xff] %v5594_v29 }
  0x76   : > { %1308 = vrot.lane.b32.xlu1 %v1280_v48, %s5329_s23 }
  0x78   : > { %1298 = vrot.lane.b32.xlu0 %v5526_v46, %s5329_s23 }
  0x79   : > { %v5643_v8 = vld.sshfl [vmem:[#allocation1] sm:$0xff pattern:$0x75316420]  ;;  %v5645_v10 = vld.sshfl [vmem:[#allocation1 + $0x8] sm:$0xff pattern:$0x75316420] }
  0x7a   : > { %1296 = vrot.lane.b32.xlu2 %v5528_v47, %s5329_s23  ;;  %2218 = vst [vmem:[#allocation1] ss:$2 sm:$0xff] %v5557_v58  ;;  %v2229_v15 = vld.sshfl [vmem:[#allocation1 + $0x20] sm:$0xff pattern:$0x75316420] }
  0x7b   : > { %v2230_v18 = vld.sshfl [vmem:[#allocation1 + $0x28] sm:$0xff pattern:$0x75316420]  ;;  %v2239_v40 = vld.sshfl [vmem:[#allocation1 + $0x10] sm:$0xff pattern:$0x75316420] }
  0x7c   : > { %2235 = vst [vmem:[#allocation1 + $0x20] ss:$2 sm:$0xff] %v5600_v31  ;;  %v2240_v41 = vld.sshfl [vmem:[#allocation1 + $0x18] sm:$0xff pattern:$0x75316420] }
  0x7d   : > { %2722 = vst [vmem:[#allocation1 + $0x10] ss:$2 sm:$0xff] %v5541_v52  ;;  %v2244_v46 = vld.sshfl [vmem:[#allocation1 + $0x38] sm:$0xff pattern:$0x75316420] }
  0x7e   : > { %1306 = vrot.lane.b32.xlu1 %v5524_v45, %s5329_s23  ;;  %v2243_v47 = vld.sshfl [vmem:[#allocation1 + $0x30] sm:$0xff pattern:$0x75316420] }
  0x7f   : > { %2726 = vst [vmem:[#allocation1 + $0x30] ss:$2 sm:$0xff] %v5581_v25 }
  0x80   : > { %1312 = vrot.lane.b32.xlu0 %v5544_v54, %s5329_s23 }
  0x81   : > { %v2225_v20 = vld.sshfl [vmem:[#allocation1] sm:$0xff pattern:$0x75316420]  ;;  %v2226_v21 = vld.sshfl [vmem:[#allocation1 + $0x8] sm:$0xff pattern:$0x75316420] }
  0x82   : > { %1316 = vrot.lane.b32.xlu2 %v5537_v51, %s5329_s23  ;;  %2233 = vst [vmem:[#allocation1] ss:$2 sm:$0xff] %v5586_v26 }
  0x83   : > { %v2241_v52 = vld.sshfl [vmem:[#allocation1 + $0x20] sm:$0xff pattern:$0x75316420]  ;;  %v2242_v53 = vld.sshfl [vmem:[#allocation1 + $0x28] sm:$0xff pattern:$0x75316420] }
  0x84   : > { %v5740_v44 = vld.sshfl [vmem:[#allocation1 + $0x10] sm:$0xff pattern:$0x75316420]  ;;  %v5742_v45 = vld.sshfl [vmem:[#allocation1 + $0x18] sm:$0xff pattern:$0x75316420] }
  0x85   : > { %2736 = vst [vmem:[#allocation1 + $0x10] ss:$2 sm:$0xff] %v5554_v57 }
  0x86   : > { %1320 = vrot.lane.b32.xlu1 %v5551_v56, %s5329_s23  ;;  %2724 = vst [vmem:[#allocation1 + $0x20] ss:$2 sm:$0xff] %v5567_v62 }
  0x88   : > { %1318 = vrot.lane.b32.xlu0 %v5535_v50, %s5329_s23 }
  0x89   : > { %v2238_v22 = vld.sshfl [vmem:[#allocation1 + $0x8] sm:$0xff pattern:$0x75316420]  ;;  %v2237_v23 = vld.sshfl [vmem:[#allocation1] sm:$0xff pattern:$0x75316420] }
  0x8a   : > { %1314 = vrot.lane.b32.xlu2 %v5548_v55, %s5329_s23  ;;  %2245 = vst [vmem:[#allocation1] ss:$2 sm:$0xff] %v2190_v38  ;;  %v5757_v55 = vld [vmem:[%s6995_s1 + $0x8] sm:$0xff] }
  0x8e   : > { %1326 = vrot.lane.b32.xlu1 %v5574_v2, %s5329_s23  ;;  %v5773_v2 = vld.sshfl [vmem:[#allocation1 + $0x28] sm:$0xff pattern:$0x75316420] }
  0x90   : > { %1324 = vrot.lane.b32.xlu0 %v5578_v24, %s5329_s23 }
  0x91   : > { %v2246_v42 = vld.sshfl [vmem:[#allocation1] sm:$0xff pattern:$0x75316420] }
  0x92   : > { %1328 = vrot.lane.b32.xlu2 %v5571_v63, %s5329_s23  ;;  %2720 = vst [vmem:[#allocation1] ss:$2 sm:$0xff] %v5557_v58  ;;  %v2731_v63 = vld.sshfl [vmem:[#allocation1 + $0x20] sm:$0xff pattern:$0x75316420] }
  0x93   : > { %2737 = vst [vmem:[#allocation1 + $0x20] ss:$2 sm:$0xff] %v5600_v31  ;;  %v5793_v31 = vld.sshfl [vmem:[#allocation1 + $0x10] sm:$0xff pattern:$0x75316420] }
  0x96   : > { %2251 = vrot.lane.b32.xlu1 %v2227_v14, %s5328_s22 }
  0x98   : > { %1322 = vrot.lane.b32.xlu0 %v5562_v60, %s5329_s23 }
  0x99   : > { %v5747_v49 = vld.sshfl [vmem:[#allocation1 + $0x8] sm:$0xff pattern:$0x75316420]  ;;  %v5750_v50 = vld.sshfl [vmem:[#allocation1] sm:$0xff pattern:$0x75316420] }
  0x9a   : > { %2253 = vrot.lane.b32.xlu2 %v2228_v17, %s5328_s22  ;;  %2735 = vst [vmem:[#allocation1] ss:$2 sm:$0xff] %v5586_v26  ;;  %v5798_v17 = vld.sshfl [vmem:[#allocation1 + $0x38] sm:$0xff pattern:$0x75316420] }
  0x9b   : > { %v5814_v38 = vld.sshfl [vmem:[#allocation1 + $0x20] sm:$0xff pattern:$0x75316420] }
  0x9c   : > { %v796_v39 = vpop.permute.xlu2 %795 }
  0x9e   : > { %2247 = vrot.lane.b32.xlu1 %v2225_v20, %s5328_s22 }
  0xa0   : > { %2255 = vrot.lane.b32.xlu0 %v2229_v15, %s5328_s22 }
  0xa1   : > { %v5804_v20 = vld.sshfl [vmem:[#allocation1] sm:$0xff pattern:$0x75316420] }
  0xa2   : > { %2249 = vrot.lane.b32.xlu2 %v2226_v21, %s5328_s22  ;;  %v5807_v21 = vld.sshfl [vmem:[#allocation1 + $0x8] sm:$0xff pattern:$0x75316420] }
  0xa4   : > { %v5736_v43 = vpop.permute.xlu2 %805 }
  0xa6   : > { %2261 = vrot.lane.b32.xlu1 %v2232_v16, %s5328_s22 }
  0xa8   : > { %2259 = vrot.lane.b32.xlu0 %v2231_v19, %s5328_s22  ;;  %v2733_v19 = vld.sshfl [vmem:[#allocation1 + $0x30] sm:$0xff pattern:$0x75316420] }
  0xa9   : > { %2738 = vst [vmem:[#allocation1 + $0x30] ss:$2 sm:$0xff] %v5594_v29  ;;  %v2692_v29 = vld [vmem:[%s5429_s21 + $0x44] sm:$0xf] }
  0xaa   : > { %2263 = vrot.lane.b32.xlu2 %v2237_v23, %s5328_s22  ;;  %2747 = vst [vmem:[#allocation1] ss:$2 sm:$0xff] %v2692_v29 }
  0xac   : > { %v804_v48 = vpop.permute.xlu2 %803 }
  0xad   : > { %v833_v57 = vsel %vm827_vm2, %v804_v48, %v5736_v43 }
  0xae   : > { %2267 = vrot.lane.b32.xlu1 %v2239_v40, %s5328_s22 }
  0xb0   : > { %2257 = vrot.lane.b32.xlu0 %v2230_v18, %s5328_s22  ;;  %v802_v51 = vpop.permute.xlu1 %801  ;;  %v5800_v18 = vld.sshfl [vmem:[#allocation1 + $0x18] sm:$0xff pattern:$0x75316420] }
  0xb1   : > { %v832_v14 = vsel %vm827_vm2, %v802_v51, %v804_v48  ;;  %3222 = vst [vmem:[#allocation1 + $0x10] ss:$2 sm:$0xff] %v5436_v0 }
  0xb2   : > { %v798_v54 = vpop.permute.xlu0 %797  ;;  %2269 = vrot.lane.b32.xlu2 %v2240_v41, %s5328_s22 }
  0xb3   : > { %v829_v56 = vsel %vm827_vm2, %v796_v39, %v798_v54 }
  0xb4   : > { %4878 = vmatpush.msk.msra.mxu1 %vm343_vm0, %v829_v56  ;;  %v5765_v58 = vpop.permute.xlu2 %817  ;;  %v5867_v56 = vld [vmem:[%s5429_s21 + $0x40] sm:$0xff] }
  0xb5   : > { %4879 = vmatmul.msk.f32.vlgmr.msra.gmra.mxu1 %vm339_vm1, %v5757_v55 }
  0xb6   : > { %2265 = vrot.lane.b32.xlu1 %v2238_v22, %s5328_s22  ;;  %4886 = vmatpush.msk.msrb.mxu1 %vm343_vm0, %v833_v57 }
  0xb8   : > { %2271 = vrot.lane.b32.xlu0 %v2241_v52, %s5328_s22  ;;  %v794_v60 = vpop.permute.xlu1 %793 }
  0xb9   : > { %v828_v62 = vsel %vm827_vm2, %v794_v60, %v796_v39  ;;  %v5816_v39 = vld.sshfl [vmem:[#allocation1 + $0x28] sm:$0xff pattern:$0x75316420] }
  0xba   : > { %v800_v24 = vpop.permute.xlu0 %799  ;;  %4876 = vmatpush.msk.msra.mxu0 %vm343_vm0, %v828_v62  ;;  %2275 = vrot.lane.b32.xlu2 %v2243_v47, %s5328_s22  ;;  %3224 = vst [vmem:[#allocation1 + $0x20] ss:$2 sm:$0xff] %v5447_v3  ;;  %v5839_v47 = vld.sshfl [vmem:[#allocation1 + $0x38] sm:$0xff pattern:$0x75316420] }
  0xbb   : > { %v830_v25 = vsel %vm827_vm2, %v798_v54, %v800_v24  ;;  %v831_v26 = vsel %vm827_vm2, %v800_v24, %v802_v51  ;;  %4877 = vmatmul.msk.f32.vlgmr.msra.gmra.mxu0 %vm339_vm1, %v5757_v55 }
  0xbc   : > { %4880 = vmatpush.msk.msra.mxu2 %vm343_vm0, %v830_v25  ;;  %4882 = vmatpush.msk.msra.mxu3 %vm343_vm0, %v831_v26  ;;  %v5784_v35 = vpop.permute.xlu2 %823 }
  0xbd   : > { %4881 = vmatmul.msk.f32.vlgmr.msra.gmra.mxu2 %vm339_vm1, %v5757_v55  ;;  %4883 = vmatmul.msk.f32.vlgmr.msra.gmra.mxu3 %vm339_vm1, %v5757_v55 }
  0xbe   : > { %4884 = vmatpush.msk.msrb.mxu0 %vm343_vm0, %v832_v14  ;;  %2279 = vrot.lane.b32.xlu1 %v2246_v42, %s5328_s22  ;;  %v5832_v42 = vld.sshfl [vmem:[#allocation1 + $0x10] sm:$0xff pattern:$0x75316420] }
  0xbf   : > { %4887 = vmatmul.msk.f32.vlgmr.msrb.gmra.mxu1 %vm339_vm1, %v5757_v55 }
  0xc0   : > { %2277 = vrot.lane.b32.xlu0 %v2244_v46, %s5328_s22  ;;  %v810_v15 = vpop.permute.xlu1 %809 }
  0xc1   : > { %v5847_v51 = vld.sshfl [vmem:[#allocation1 + $0x20] sm:$0xff pattern:$0x75316420] }
  0xc2   : > { %v808_v16 = vpop.permute.xlu0 %807  ;;  %2273 = vrot.lane.b32.xlu2 %v2242_v53, %s5328_s22  ;;  %v5854_v53 = vld.sshfl [vmem:[#allocation1] sm:$0xff pattern:$0x75316420] }
  0xc3   : > { %v834_v22 = vsel %vm827_vm2, %v5736_v43, %v808_v16  ;;  %v835_v23 = vsel %vm827_vm2, %v808_v16, %v810_v15  ;;  %4885 = vmatmul.msk.f32.vlgmr.msrb.gmra.mxu0 %vm339_vm1, %v5757_v55  ;;  %v5834_v43 = vld.sshfl [vmem:[#allocation1 + $0x18] sm:$0xff pattern:$0x75316420]  ;;  %3220 = vst [vmem:[#allocation1] ss:$2 sm:$0xff] %v5439_v1 }
  0xc4   : > { %4888 = vmatpush.msk.msrb.mxu2 %vm343_vm0, %v834_v22  ;;  %4890 = vmatpush.msk.msrb.mxu3 %vm343_vm0, %v835_v23  ;;  %v5820_v40 = vpop.permute.xlu2 %1300  ;;  %3236 = vst [vmem:[#allocation1 + $0x10] ss:$2 sm:$0xff] %v5452_v4  ;;  %v5852_v4 = vld.sshfl [vmem:[#allocation1 + $0x28] sm:$0xff pattern:$0x75316420] }
  0xc5   : > { %4889 = vmatmul.msk.f32.vlgmr.msrb.gmra.mxu2 %vm339_vm1, %v5757_v55  ;;  %4891 = vmatmul.msk.f32.vlgmr.msrb.gmra.mxu3 %vm339_vm1, %v5757_v55  ;;  %3237 = vst [vmem:[#allocation1 + $0x20] ss:$2 sm:$0xff] %v5475_v13 }
  0xc6   : > { %2755 = vrot.lane.b32.xlu1 %v5742_v45, %s5329_s23  ;;  %v5843_v45 = vld.sshfl [vmem:[#allocation1 + $0x30] sm:$0xff pattern:$0x75316420] }
  0xc7   : > { %3226 = vst [vmem:[#allocation1 + $0x30] ss:$2 sm:$0xff] %v5465_v9 }
  0xc8   : > { %2753 = vrot.lane.b32.xlu0 %v5740_v44, %s5329_s23  ;;  %v816_v41 = vpop.permute.xlu1 %815 }
  0xc9   : > { %v839_v46 = vsel %vm827_vm2, %v816_v41, %v5765_v58 }
  0xca   : > { %v814_v48 = vpop.permute.xlu0 %813  ;;  %4898 = vmatpush.msk.msra.mxu3 %vm343_vm0, %v839_v46  ;;  %2757 = vrot.lane.b32.xlu2 %v2731_v63, %s5329_s23  ;;  %v5898_v16 = vld.sshfl [vmem:[#allocation1 + $0x8] sm:$0xff pattern:$0x75316420] }
  0xcb   : > { %v838_v44 = vsel %vm827_vm2, %v814_v48, %v816_v41  ;;  %v5882_v25 = vld.sshfl [vmem:[#allocation1 + $0x18] sm:$0xff pattern:$0x75316420] }
  0xcc   : > { %4896 = vmatpush.msk.msra.mxu2 %vm343_vm0, %v838_v44  ;;  %v5850_v52 = vpop.permute.xlu2 %1310  ;;  %v5888_v14 = vld.sshfl [vmem:[#allocation1 + $0x20] sm:$0xff pattern:$0x75316420] }
  0xcd   : > { %4897 = vmatmul.msk.f32.vlgmr.msra.gmra.mxu2 %vm339_vm1, %v5757_v55  ;;  %4899 = vmatmul.msk.f32.vlgmr.msra.gmra.mxu3 %vm339_vm1, %v5757_v55 }
  0xce   : > { %2751 = vrot.lane.b32.xlu1 %v5747_v49, %s5329_s23  ;;  %v5873_v62 = vld.sshfl [vmem:[#allocation1 + $0x30] sm:$0xff pattern:$0x75316420]  ;;  %v5875_v63 = vld.sshfl [vmem:[#allocation1 + $0x38] sm:$0xff pattern:$0x75316420] }
  0xcf   : > { %3238 = vst [vmem:[#allocation1 + $0x30] ss:$2 sm:$0xff] %v5867_v56 }
  0xd0   : > { %2749 = vrot.lane.b32.xlu0 %v5750_v50, %s5329_s23  ;;  %v822_v54 = vpop.permute.xlu1 %821  ;;  %v5880_v50 = vld.sshfl [vmem:[#allocation1 + $0x10] sm:$0xff pattern:$0x75316420] }
  0xd1   : > { %v842_v57 = vsel %vm827_vm2, %v822_v54, %v5784_v35  ;;  %3672 = vst [vmem:[#allocation1 + $0x10] ss:$2 sm:$0xff] %v5436_v0 }
  0xd2   : > { %v812_v60 = vpop.permute.xlu0 %811  ;;  %4904 = vmatpush.msk.msrb.mxu2 %vm343_vm0, %v842_v57  ;;  %2761 = vrot.lane.b32.xlu2 %v2733_v19, %s5329_s23  ;;  %v5890_v19 = vld.sshfl [vmem:[#allocation1 + $0x28] sm:$0xff pattern:$0x75316420] }
  0xd3   : > { %v836_v49 = vsel %vm827_vm2, %v810_v15, %v812_v60  ;;  %v837_v24 = vsel %vm827_vm2, %v812_v60, %v814_v48  ;;  %v5896_v15 = vld.sshfl [vmem:[#allocation1] sm:$0xff pattern:$0x75316420]  ;;  %3674 = vst [vmem:[#allocation1 + $0x20] ss:$2 sm:$0xff] %v5447_v3 }
  0xd4   : > { %4892 = vmatpush.msk.msra.mxu0 %vm343_vm0, %v836_v49  ;;  %4894 = vmatpush.msk.msra.mxu1 %vm343_vm0, %v837_v24  ;;  %v5886_v26 = vpop.permute.xlu2 %1296  ;;  %3235 = vst [vmem:[#allocation1] ss:$2 sm:$0xff] %v5455_v5  ;;  %v5970_v24 = vld [vmem:[%s5429_s21 + $0x30] sm:$0xff] }
  0xd5   : > { %4893 = vmatmul.msk.f32.vlgmr.msra.gmra.mxu0 %vm339_vm1, %v5757_v55  ;;  %4895 = vmatmul.msk.f32.vlgmr.msra.gmra.mxu1 %vm339_vm1, %v5757_v55 }
  0xd6   : > { %4905 = vmatmul.msk.f32.vlgmr.msrb.gmra.mxu2 %vm339_vm1, %v5757_v55  ;;  %2765 = vrot.lane.b32.xlu1 %v5804_v20, %s5329_s23  ;;  %v5914_v20 = vld.sshfl [vmem:[#allocation1 + $0x30] sm:$0xff pattern:$0x75316420]  ;;  %v5916_v46 = vld.sshfl [vmem:[#allocation1 + $0x38] sm:$0xff pattern:$0x75316420] }
  0xd7   : > { %3676 = vst [vmem:[#allocation1 + $0x30] ss:$2 sm:$0xff] %v5465_v9 }
  0xd8   : > { %2763 = vrot.lane.b32.xlu0 %v5798_v17, %s5329_s23  ;;  %v820_v22 = vpop.permute.xlu1 %819  ;;  %v3680_v57 = vld.sshfl [vmem:[#allocation1 + $0x18] sm:$0xff pattern:$0x75316420]  ;;  %v3679_v49 = vld.sshfl [vmem:[#allocation1 + $0x10] sm:$0xff pattern:$0x75316420] }
  0xd9   : > { %v840_v23 = vsel %vm827_vm2, %v5765_v58, %v820_v22  ;;  %v841_v29 = vsel %vm827_vm2, %v820_v22, %v822_v54  ;;  %3686 = vst [vmem:[#allocation1 + $0x10] ss:$2 sm:$0xff] %v5970_v24 }
  0xda   : > { %v826_v41 = vpop.permute.xlu0 %825  ;;  %4900 = vmatpush.msk.msrb.mxu0 %vm343_vm0, %v840_v23  ;;  %4902 = vmatpush.msk.msrb.mxu1 %vm343_vm0, %v841_v29 }
  0xdb   : > { %v843_v3 = vsel %vm827_vm2, %v5784_v35, %v826_v41  ;;  %2759 = vrot.lane.b32.xlu2 %v5773_v2, %s5329_s23  ;;  %v5930_v58 = vld.sshfl [vmem:[#allocation1] sm:$0xff pattern:$0x75316420]  ;;  %v5932_v17 = vld.sshfl [vmem:[#allocation1 + $0x8] sm:$0xff pattern:$0x75316420] }
  0xdc   : > { %4906 = vmatpush.msk.msrb.mxu3 %vm343_vm0, %v843_v3  ;;  %v5924_v0 = vpop.permute.xlu2 %1316  ;;  %3670 = vst [vmem:[#allocation1] ss:$2 sm:$0xff] %v5439_v1  ;;  %v5944_v35 = vld [vmem:[%s6995_s1 + $0x10] sm:$0xff] }
  0xdd   : > { %4901 = vmatmul.msk.f32.vlgmr.msrb.gmra.mxu0 %vm339_vm1, %v5757_v55  ;;  %4903 = vmatmul.msk.f32.vlgmr.msrb.gmra.mxu1 %vm339_vm1, %v5757_v55 }
  0xde   : > { %4907 = vmatmul.msk.f32.vlgmr.msrb.gmra.mxu3 %vm339_vm1, %v5757_v55  ;;  %2771 = vrot.lane.b32.xlu1 %v5800_v18, %s5329_s23  ;;  %v3683_v3 = vld.sshfl [vmem:[#allocation1 + $0x30] sm:$0xff pattern:$0x75316420] }
  0xe0   : > { %2769 = vrot.lane.b32.xlu0 %v5793_v31, %s5329_s23  ;;  %v1305_v9 = vpop.permute.xlu1 %1304  ;;  %v3681_v31 = vld.sshfl [vmem:[#allocation1 + $0x20] sm:$0xff pattern:$0x75316420] }
  0xe2   : > { %v1303_v2 = vpop.permute.xlu0 %1302 }
  0xe3   : > { %v1333_v48 = vsel %vm1330_vm3, %v5820_v40, %v1303_v2  ;;  %v1334_v55 = vsel %vm1330_vm3, %v1303_v2, %v1305_v9  ;;  %2773 = vrot.lane.b32.xlu2 %v5814_v38, %s5329_s23  ;;  %v5955_v18 = vld.sshfl [vmem:[#allocation1 + $0x8] sm:$0xff pattern:$0x75316420]  ;;  %v3677_v44 = vld.sshfl [vmem:[#allocation1] sm:$0xff pattern:$0x75316420] }
  0xe4   : > { %4913 = vmatpush.msk.msra.mxu2 %vm343_vm0, %v1333_v48  ;;  %4915 = vmatpush.msk.msra.mxu3 %vm343_vm0, %v1334_v55  ;;  %v1315_v1 = vpop.permute.xlu2 %1314  ;;  %v5961_v38 = vld.sshfl [vmem:[#allocation1 + $0x28] sm:$0xff pattern:$0x75316420]  ;;  %3685 = vst [vmem:[#allocation1] ss:$2 sm:$0xff] %v5455_v5 }
  0xe5   : > { %4914 = vmatmul.msk.f32.vlgmr.msra.gmra.mxu2 %vm339_vm1, %v5944_v35  ;;  %3687 = vst [vmem:[#allocation1 + $0x20] ss:$2 sm:$0xff] %v5475_v13  ;;  %v3684_v2 = vld.sshfl [vmem:[#allocation1 + $0x38] sm:$0xff pattern:$0x75316420] }
  0xe6   : > { %4916 = vmatmul.msk.f32.vlgmr.msra.gmra.mxu3 %vm339_vm1, %v5944_v35  ;;  %2777 = vrot.lane.b32.xlu1 %v5843_v45, %s5329_s23  ;;  %3688 = vst [vmem:[#allocation1 + $0x30] ss:$2 sm:$0xff] %v5867_v56  ;;  %v3692_v55 = vld.sshfl [vmem:[#allocation1 + $0x18] sm:$0xff pattern:$0x75316420] }
  0xe8   : > { %2767 = vrot.lane.b32.xlu0 %v5807_v21, %s5329_s23  ;;  %v1309_v54 = vpop.permute.xlu1 %1308  ;;  %v3642_v21 = vld [vmem:[%s5429_s21 + $0x48] sm:$0xf] }
  0xe9   : > { %v1337_v60 = vsel %vm1330_vm3, %v1309_v54, %v5850_v52 }
  0xea   : > { %v1299_v22 = vpop.permute.xlu0 %1298  ;;  %4921 = vmatpush.msk.msrb.mxu2 %vm343_vm0, %v1337_v60  ;;  %v4137_v60 = vld [vmem:[%s5429_s21 + $0x10] sm:$0xff] }
  0xeb   : > { %v1331_v5 = vsel %vm1330_vm3, %v5886_v26, %v1299_v22  ;;  %v1332_v13 = vsel %vm1330_vm3, %v1299_v22, %v5820_v40  ;;  %2779 = vrot.lane.b32.xlu2 %v5839_v47, %s5329_s23  ;;  %v5987_v23 = vld.sshfl [vmem:[#allocation1] sm:$0xff pattern:$0x75316420]  ;;  %v5989_v26 = vld.sshfl [vmem:[#allocation1 + $0x8] sm:$0xff pattern:$0x75316420]  ;;  %v1340_v47 = vsel %vm1330_vm3, %v1315_v1, %v5924_v0 }
  0xec   : > { %4909 = vmatpush.msk.msra.mxu0 %vm343_vm0, %v1331_v5  ;;  %4911 = vmatpush.msk.msra.mxu1 %vm343_vm0, %v1332_v13  ;;  %v1329_v45 = vpop.permute.xlu2 %1328  ;;  %3697 = vst [vmem:[#allocation1] ss:$2 sm:$0xff] %v3642_v21  ;;  %v3693_v13 = vld.sshfl [vmem:[#allocation1 + $0x20] sm:$0xff pattern:$0x75316420] }
  0xed   : > { %4910 = vmatmul.msk.f32.vlgmr.msra.gmra.mxu0 %vm339_vm1, %v5944_v35  ;;  %4912 = vmatmul.msk.f32.vlgmr.msra.gmra.mxu1 %vm339_vm1, %v5944_v35  ;;  %v4138_v21 = vld [vmem:[%s5429_s21 + $0x18] sm:$0xff] }
  0xee   : > { %4922 = vmatmul.msk.f32.vlgmr.msrb.gmra.mxu2 %vm339_vm1, %v5944_v35  ;;  %2775 = vrot.lane.b32.xlu1 %v5816_v39, %s5329_s23 }
  0xf0   : > { %2781 = vrot.lane.b32.xlu0 %v5854_v53, %s5329_s23  ;;  %v1307_v40 = vpop.permute.xlu1 %1306 }
  0xf1   : > { %v1335_v29 = vsel %vm1330_vm3, %v1305_v9, %v1307_v40  ;;  %v1336_v41 = vsel %vm1330_vm3, %v1307_v40, %v1309_v54  ;;  %v3691_v54 = vld.sshfl [vmem:[#allocation1 + $0x10] sm:$0xff pattern:$0x75316420] }
  0xf2   : > { %v1313_v48 = vpop.permute.xlu0 %1312  ;;  %4917 = vmatpush.msk.msrb.mxu0 %vm343_vm0, %v1335_v29  ;;  %4919 = vmatpush.msk.msrb.mxu1 %vm343_vm0, %v1336_v41  ;;  %4174 = vst [vmem:[#allocation1 + $0x10] ss:$2 sm:$0xff] %v4137_v60  ;;  %v4136_v40 = vld [vmem:[%s5429_s21 + $0x8] sm:$0xff]  ;;  %v6175_v60 = vpop.f32.mrf.mxu3 }
  0xf3   : > { %v1338_v39 = vsel %vm1330_vm3, %v5850_v52, %v1313_v48  ;;  %v1339_v53 = vsel %vm1330_vm3, %v1313_v48, %v1315_v1  ;;  %3703 = vrot.lane.b32.xlu2 %v3679_v49, %s5328_s22  ;;  %v3695_v41 = vld.sshfl [vmem:[#allocation1 + $0x30] sm:$0xff pattern:$0x75316420] }
  0xf4   : > { %4927 = vmatpush.msk.msra.mxu1 %vm343_vm0, %v1340_v47  ;;  %4923 = vmatpush.msk.msrb.mxu3 %vm343_vm0, %v1338_v39  ;;  %v6011_v9 = vpop.permute.xlu2 %2253 }
  0xf5   : > { %4925 = vmatpush.msk.msra.mxu0 %vm343_vm0, %v1339_v53  ;;  %4920 = vmatmul.msk.f32.vlgmr.msrb.gmra.mxu1 %vm339_vm1, %v5944_v35 }
  0xf6   : > { %4918 = vmatmul.msk.f32.vlgmr.msrb.gmra.mxu0 %vm339_vm1, %v5944_v35  ;;  %4924 = vmatmul.msk.f32.vlgmr.msrb.gmra.mxu3 %vm339_vm1, %v5944_v35 }
  0xf7   : > { %3707 = vrot.lane.b32.xlu1 %v3681_v31, %s5328_s22 }
  0xf8   : > { %3705 = vrot.lane.b32.xlu0 %v3680_v57, %s5328_s22  ;;  %v1321_v52 = vpop.permute.xlu1 %1320 }
  0xfa   : > { %v1319_v1 = vpop.permute.xlu0 %1318 }
  0xfb   : > { %v1341_v49 = vsel %vm1330_vm3, %v5924_v0, %v1319_v1  ;;  %v1342_v22 = vsel %vm1330_vm3, %v1319_v1, %v1321_v52  ;;  %3699 = vrot.lane.b32.xlu2 %v3677_v44, %s5328_s22  ;;  %v6041_v44 = vld.sshfl [vmem:[#allocation1 + $0x28] sm:$0xff pattern:$0x75316420] }
  0xfc   : > { %4929 = vmatpush.msk.msra.mxu2 %vm343_vm0, %v1341_v49  ;;  %4931 = vmatpush.msk.msra.mxu3 %vm343_vm0, %v1342_v22  ;;  %v6028_v31 = vpop.permute.xlu2 %2249  ;;  %4176 = vst [vmem:[#allocation1 + $0x20] ss:$2 sm:$0xff] %v4138_v21  ;;  %v6210_v21 = vld [vmem:[%s6995_s1 + $0x20] sm:$0xff] }
  0xfd   : > { %4928 = vmatmul.msk.f32.vlgmr.msra.gmra.mxu1 %vm339_vm1, %v5944_v35  ;;  %4930 = vmatmul.msk.f32.vlgmr.msra.gmra.mxu2 %vm339_vm1, %v5944_v35 }
  0xfe   : > { %4926 = vmatmul.msk.f32.vlgmr.msra.gmra.mxu0 %vm339_vm1, %v5944_v35  ;;  %4932 = vmatmul.msk.f32.vlgmr.msra.gmra.mxu3 %vm339_vm1, %v5944_v35 }
  0xff   : > { %3711 = vrot.lane.b32.xlu1 %v3683_v3, %s5328_s22  ;;  %v4139_v3 = vld [vmem:[%s5429_s21 + $0x20] sm:$0xff] }
 0x100   : > { %3701 = vrot.lane.b32.xlu0 %v5955_v18, %s5328_s22  ;;  %v1327_v0 = vpop.permute.xlu1 %1326  ;;  %v3698_v18 = vld.sshfl [vmem:[#allocation1] sm:$0xff pattern:$0x75316420] }
 0x101   : > { %v1346_v57 = vsel %vm1330_vm3, %v1327_v0, %v1329_v45  ;;  %4172 = vst [vmem:[#allocation1] ss:$2 sm:$0xff] %v4136_v40 }
 0x102   : > { %v1325_v5 = vpop.permute.xlu0 %1324  ;;  %4939 = vmatpush.msk.msrb.mxu3 %vm343_vm0, %v1346_v57 }
 0x103   : > { %v1345_v47 = vsel %vm1330_vm3, %v1325_v5, %v1327_v0  ;;  %3713 = vrot.lane.b32.xlu2 %v3684_v2, %s5328_s22  ;;  %v6172_v1 = vld.sshfl [vmem:[#allocation1 + $0x28] sm:$0xff pattern:$0x75316420] }
 0x104   : > { %4948 = vmatpush.msk.msra.mxu3 %vm343_vm0, %v5564_v61  ;;  %4937 = vmatpush.msk.msrb.mxu2 %vm343_vm0, %v1345_v47  ;;  %v6052_v29 = vpop.permute.xlu2 %2263  ;;  %v4144_v47 = vld [vmem:[%s5429_s21 + $0x48] sm:$0xf] }
 0x105   : > { %4938 = vmatmul.msk.f32.vlgmr.msrb.gmra.mxu2 %vm339_vm1, %v5944_v35 }
 0x106   : > { %4946 = vmatpush.msk.msra.mxu2 %vm343_vm0, %v5560_v59  ;;  %4940 = vmatmul.msk.f32.vlgmr.msrb.gmra.mxu3 %vm339_vm1, %v5944_v35  ;;  %v3696_v59 = vld.sshfl [vmem:[#allocation1 + $0x38] sm:$0xff pattern:$0x75316420] }
 0x107   : > { %3709 = vrot.lane.b32.xlu1 %v5961_v38, %s5328_s22  ;;  %4956 = vmatpush.msk.msrb.mxu3 %vm343_vm0, %v5622_v37  ;;  %4178 = vst [vmem:[#allocation1 + $0x30] ss:$2 sm:$0xff] %v4139_v3 }
 0x108   : > { %4954 = vmatpush.msk.msrb.mxu2 %vm343_vm0, %v5620_v36  ;;  %3715 = vrot.lane.b32.xlu0 %v5987_v23, %s5328_s22  ;;  %v6066_v61 = vpop.permute.xlu1 %2251  ;;  %v6076_v36 = vld [vmem:[%s6995_s1 + $0x18] sm:$0xff] }
 0x10a   : > { %v1323_v45 = vpop.permute.xlu0 %1322 }
 0x10b   : > { %v1343_v2 = vsel %vm1330_vm3, %v1321_v52, %v1323_v45  ;;  %v1344_v48 = vsel %vm1330_vm3, %v1323_v45, %v1325_v5  ;;  %3719 = vrot.lane.b32.xlu2 %v3691_v54, %s5328_s22  ;;  %v6170_v52 = vpop.f32.mrf.mxu0  ;;  %v4142_v54 = vld [vmem:[%s5429_s21 + $0x38] sm:$0xff]  ;;  %v6223_v45 = vpop.f32.mrf.mxu3 }
 0x10c   : > { %4935 = vmatpush.msk.msrb.mxu1 %vm343_vm0, %v1344_v48  ;;  %4933 = vmatpush.msk.msrb.mxu0 %vm343_vm0, %v1343_v2  ;;  %v6081_v37 = vpop.permute.xlu2 %2269 }
 0x10d   : > { %4934 = vmatmul.msk.f32.vlgmr.msrb.gmra.mxu0 %vm339_vm1, %v5944_v35  ;;  %4936 = vmatmul.msk.f32.vlgmr.msrb.gmra.mxu1 %vm339_vm1, %v5944_v35  ;;  %v4181_v35 = vld.sshfl [vmem:[#allocation1 + $0x10] sm:$0xff pattern:$0x75316420] }
 0x10e   : > { %4947 = vmatmul.msk.f32.vlgmr.msra.gmra.mxu2 %vm339_vm1, %v6076_v36  ;;  %4949 = vmatmul.msk.f32.vlgmr.msra.gmra.mxu3 %vm339_vm1, %v6076_v36  ;;  %v6109_v39 = vld.sshfl [vmem:[#allocation1 + $0x38] sm:$0xff pattern:$0x75316420] }
 0x10f   : > { %3723 = vrot.lane.b32.xlu1 %v3693_v13, %s5328_s22  ;;  %4944 = vmatpush.msk.msra.mxu1 %vm343_vm0, %v5602_v32  ;;  %v6107_v32 = vld.sshfl [vmem:[#allocation1 + $0x30] sm:$0xff pattern:$0x75316420] }
 0x110   : > { %3721 = vrot.lane.b32.xlu0 %v3692_v55, %s5328_s22  ;;  %v2248_v38 = vpop.permute.xlu1 %2247  ;;  %4942 = vmatpush.msk.msra.mxu0 %vm343_vm0, %v5597_v30  ;;  %4190 = vst [vmem:[#allocation1 + $0x30] ss:$2 sm:$0xff] %v5867_v56  ;;  %v4140_v56 = vld [vmem:[%s5429_s21 + $0x28] sm:$0xff]  ;;  %s5260_s21 = scalar_lea.hbm %s5259_s19, 128 }
 0x111   : > { %4962 = vmatpush.msk.msra.mxu2 %vm343_vm0, %v5588_v27  ;;  %4964 = vmatpush.msk.msra.mxu3 %vm343_vm0, %v5590_v28  ;;  %v4182_v27 = vld.sshfl [vmem:[#allocation1 + $0x18] sm:$0xff pattern:$0x75316420]  ;;  %v2281_v22 = vsel %vm827_vm2, %v2248_v38, %v6028_v31  ;;  %p5261_p4 = scmp.ne.s32.totalorder %s5259_s19, %s5260_s21  ;;  %p5266_p8 = scmp.lt.s32.totalorder %s5264_s24, %s5260_s21 }
 0x112   : > { %v6101_v23 = vpop.permute.xlu0 %2255  ;;  %4952 = vmatpush.msk.msrb.mxu1 %vm343_vm0, %v5607_v34  ;;  %4950 = vmatpush.msk.msrb.mxu0 %vm343_vm0, %v5604_v33  ;;  %4188 = vst [vmem:[#allocation1 + $0x10] ss:$2 sm:$0xff] %v5970_v24  ;;  %v4179_v33 = vld.sshfl [vmem:[#allocation1] sm:$0xff pattern:$0x75316420] }
 0x113   : > { %3717 = vrot.lane.b32.xlu2 %v5989_v26, %s5328_s22  ;;  %v4180_v24 = vld.sshfl [vmem:[#allocation1 + $0x8] sm:$0xff pattern:$0x75316420]  ;;  %v6159_v26 = vpop.f32.mrf.mxu2  ;;  %p5262_p5 = pnand %p5261_p4, %p5402_p9  ;;  %p5267_p10 = por %p5266_p8, %p5265_p7 }
 0x114   : > { %v6114_v28 = vpop.permute.xlu2 %2275  ;;  %4187 = vst [vmem:[#allocation1] ss:$2 sm:$0xff] %v4140_v56 }
 0x115   : > { %4943 = vmatmul.msk.f32.vlgmr.msra.gmra.mxu0 %vm339_vm1, %v6076_v36  ;;  %4945 = vmatmul.msk.f32.vlgmr.msra.gmra.mxu1 %vm339_vm1, %v6076_v36  ;;  %p5263_p6 = pneg %p5262_p5 }
 0x116   : > { %4955 = vmatmul.msk.f32.vlgmr.msrb.gmra.mxu2 %vm339_vm1, %v6076_v36  ;;  %4957 = vmatmul.msk.f32.vlgmr.msrb.gmra.mxu3 %vm339_vm1, %v6076_v36 }
 0x117   : > { %3729 = vrot.lane.b32.xlu1 %v3696_v59, %s5328_s22  ;;  %4970 = vmatpush.msk.msrb.mxu2 %vm343_vm0, %v5666_v6  ;;  %p5268_p13 = pnand %p5267_p10, %p5263_p6 }
 0x118   : > { %3727 = vrot.lane.b32.xlu0 %v3695_v41, %s5328_s22  ;;  %v2262_v30 = vpop.permute.xlu1 %2261  ;;  %4972 = vmatpush.msk.msrb.mxu3 %vm343_vm0, %v5668_v7  ;;  %v6155_v7 = vpop.f32.mrf.mxu1 }
 0x119   : > { %4958 = vmatpush.msk.msra.mxu0 %vm343_vm0, %v5643_v8  ;;  %4960 = vmatpush.msk.msra.mxu1 %vm343_vm0, %v5645_v10  ;;  %v2283_v8 = vsel %vm827_vm2, %v6066_v61, %v6011_v9  ;;  %v2284_v10 = vsel %vm827_vm2, %v6011_v9, %v6101_v23  ;;  %v4183_v9 = vld.sshfl [vmem:[#allocation1 + $0x20] sm:$0xff pattern:$0x75316420]  ;;  %v4194_v56 = vld.sshfl [vmem:[#allocation1 + $0x18] sm:$0xff pattern:$0x75316420] }
 0x11a   : > { %v6135_v34 = vpop.permute.xlu0 %2259  ;;  %4189 = vst [vmem:[#allocation1 + $0x20] ss:$2 sm:$0xff] %v4142_v54 }
 0x11b   : > { %3731 = vrot.lane.b32.xlu2 %v3698_v18, %s5328_s22  ;;  %v2287_v0 = vsel %vm827_vm2, %v6135_v34, %v2262_v30  ;;  %v6205_v57 = vpop.f32.mrf.mxu2  ;;  %v4191_v13 = vld.sshfl [vmem:[#allocation1] sm:$0xff pattern:$0x75316420]  ;;  %v6212_v40 = vld.sshfl [vmem:[#allocation1 + $0x8] sm:$0xff pattern:$0x75316420]  ;;  %v6216_v18 = vpop.f32.mrf.mxu0 }
 0x11c   : > { %v6139_v6 = vpop.permute.xlu2 %2273  ;;  %4199 = vst [vmem:[#allocation1] ss:$2 sm:$0xff] %v4144_v47 }
 0x11d   : > { %4951 = vmatmul.msk.f32.vlgmr.msrb.gmra.mxu0 %vm339_vm1, %v6076_v36  ;;  %4953 = vmatmul.msk.f32.vlgmr.msrb.gmra.mxu1 %vm339_vm1, %v6076_v36 }
 0x11e   : > { %4963 = vmatmul.msk.f32.vlgmr.msra.gmra.mxu2 %vm339_vm1, %v6076_v36  ;;  %4965 = vmatmul.msk.f32.vlgmr.msra.gmra.mxu3 %vm339_vm1, %v6076_v36 }
 0x11f   : > { %4979 = vmatpush.msk.msra.mxu2 %vm343_vm0, %v2283_v8  ;;  %4981 = vmatpush.msk.msra.mxu3 %vm343_vm0, %v2284_v10 }
 0x120   : > { %4205 = vrot.lane.b32.xlu1 %v4181_v35, %s5329_s23  ;;  %3725 = vrot.lane.b32.xlu0 %v6041_v44, %s5328_s22  ;;  %v6164_v53 = vpop.permute.xlu1 %2267 }
 0x121   : > { %4968 = vmatpush.msk.msrb.mxu1 %vm343_vm0, %v5653_v12  ;;  %4966 = vmatpush.msk.msrb.mxu0 %vm343_vm0, %v5651_v11  ;;  %v2288_v12 = vsel %vm827_vm2, %v2262_v30, %v6052_v29  ;;  %v2282_v11 = vsel %vm827_vm2, %v6028_v31, %v6066_v61  ;;  %v6201_v31 = vpop.f32.mrf.mxu1  ;;  %v2291_v59 = vsel %vm827_vm2, %v6164_v53, %v6081_v37 }
 0x122   : > { %v2258_v55 = vpop.permute.xlu0 %2257 }
 0x123   : > { %4207 = vrot.lane.b32.xlu2 %v4182_v27, %s5329_s23  ;;  %v2285_v3 = vsel %vm827_vm2, %v6101_v23, %v2258_v55  ;;  %v2286_v2 = vsel %vm827_vm2, %v2258_v55, %v6135_v34  ;;  %v6250_v38 = vpop.f32.mrf.mxu2  ;;  %v6265_v30 = vpop.f32.mrf.mxu0  ;;  %v4200_v47 = vld.sshfl [vmem:[#allocation1] sm:$0xff pattern:$0x75316420] }
 0x124   : > { %v6178_v49 = vpop.permute.xlu2 %2757  ;;  %v6271_v34 = vpop.f32.mrf.mxu3 }
 0x125   : > { %4959 = vmatmul.msk.f32.vlgmr.msra.gmra.mxu0 %vm339_vm1, %v6076_v36  ;;  %4961 = vmatmul.msk.f32.vlgmr.msra.gmra.mxu1 %vm339_vm1, %v6076_v36 }
 0x126   : > { %4971 = vmatmul.msk.f32.vlgmr.msrb.gmra.mxu2 %vm339_vm1, %v6076_v36  ;;  %4973 = vmatmul.msk.f32.vlgmr.msrb.gmra.mxu3 %vm339_vm1, %v6076_v36 }
 0x127   : > { %4975 = vmatpush.msk.msra.mxu0 %vm343_vm0, %v2281_v22  ;;  %4977 = vmatpush.msk.msra.mxu1 %vm343_vm0, %v2282_v11 }
 0x128   : > { %4987 = vmatpush.msk.msrb.mxu2 %vm343_vm0, %v2287_v0  ;;  %4989 = vmatpush.msk.msrb.mxu3 %vm343_vm0, %v2288_v12  ;;  %v2266_v44 = vpop.permute.xlu1 %2265  ;;  %v4195_v12 = vld.sshfl [vmem:[#allocation1 + $0x20] sm:$0xff pattern:$0x75316420] }
 0x129   : > { %4209 = vrot.lane.b32.xlu0 %v4183_v9, %s5329_s23  ;;  %4201 = vrot.lane.b32.xlu1 %v4179_v33, %s5329_s23  ;;  %v2290_v27 = vsel %vm827_vm2, %v2266_v44, %v6164_v53  ;;  %v4193_v33 = vld.sshfl [vmem:[#allocation1 + $0x10] sm:$0xff pattern:$0x75316420] }
 0x12a   : > { %v2272_v5 = vpop.permute.xlu0 %2271 }
 0x12b   : > { %4203 = vrot.lane.b32.xlu2 %v4180_v24, %s5329_s23  ;;  %v2292_v41 = vsel %vm827_vm2, %v6081_v37, %v2272_v5  ;;  %v6247_v37 = vpop.f32.mrf.mxu1  ;;  %v2293_v55 = vsel %vm827_vm2, %v2272_v5, %v6139_v6  ;;  %v6297_v54 = vpop.f32.mrf.mxu2 }
 0x12c   : > { %v6218_v61 = vpop.permute.xlu2 %2761  ;;  %v6305_v11 = vpop.f32.mrf.mxu0 }
 0x12d   : > { %4967 = vmatmul.msk.f32.vlgmr.msrb.gmra.mxu0 %vm339_vm1, %v6076_v36  ;;  %4969 = vmatmul.msk.f32.vlgmr.msrb.gmra.mxu1 %vm339_vm1, %v6076_v36  ;;  %7003 = vst [vmem:[#allocation10_spill] sm:$0xff] %v6305_v11 }
 0x12e   : > { %4980 = vmatmul.msk.f32.vlgmr.msra.gmra.mxu2 %vm339_vm1, %v6210_v21  ;;  %4982 = vmatmul.msk.f32.vlgmr.msra.gmra.mxu3 %vm339_vm1, %v6210_v21 }
 0x12f   : > { %4983 = vmatpush.msk.msrb.mxu0 %vm343_vm0, %v2285_v3  ;;  %4985 = vmatpush.msk.msrb.mxu1 %vm343_vm0, %v2286_v2  ;;  %v4196_v3 = vld.sshfl [vmem:[#allocation1 + $0x28] sm:$0xff pattern:$0x75316420] }
 0x130   : > { %4995 = vmatpush.msk.msra.mxu2 %vm343_vm0, %v2291_v59  ;;  %4997 = vmatpush.msk.msra.mxu3 %vm343_vm0, %v2292_v41  ;;  %v2280_v48 = vpop.permute.xlu1 %2279 }
 0x131   : > { %4213 = vrot.lane.b32.xlu0 %v6107_v32, %s5329_s23  ;;  %4215 = vrot.lane.b32.xlu1 %v6109_v39, %s5329_s23  ;;  %v2289_v39 = vsel %vm827_vm2, %v6052_v29, %v2266_v44 }
 0x132   : > { %v2278_v36 = vpop.permute.xlu0 %2277 }
 0x133   : > { %4217 = vrot.lane.b32.xlu2 %v4191_v13, %s5329_s23  ;;  %v2295_v35 = vsel %vm827_vm2, %v6114_v28, %v2278_v36  ;;  %v2296_v23 = vsel %vm827_vm2, %v2278_v36, %v2280_v48  ;;  %v6281_v8 = vpop.f32.mrf.mxu1 }
 0x134   : > { %7002 = vst [vmem:[#allocation9_spill] sm:$0xff] %v6281_v8 }
 0x135   : > { %4976 = vmatmul.msk.f32.vlgmr.msra.gmra.mxu0 %vm339_vm1, %v6210_v21  ;;  %4978 = vmatmul.msk.f32.vlgmr.msra.gmra.mxu1 %vm339_vm1, %v6210_v21  ;;  %v6259_v32 = vpop.permute.xlu2 %2759 }
 0x136   : > { %4988 = vmatmul.msk.f32.vlgmr.msrb.gmra.mxu2 %vm339_vm1, %v6210_v21  ;;  %4990 = vmatmul.msk.f32.vlgmr.msrb.gmra.mxu3 %vm339_vm1, %v6210_v21 }
 0x137   : > { %4991 = vmatpush.msk.msra.mxu0 %vm343_vm0, %v2289_v39  ;;  %4993 = vmatpush.msk.msra.mxu1 %vm343_vm0, %v2290_v27  ;;  %v6345_v27 = vld [vmem:[%s6995_s1 + $0x28] sm:$0xff] }
 0x138   : > { %5003 = vmatpush.msk.msrb.mxu2 %vm343_vm0, %v2295_v35  ;;  %5005 = vmatpush.msk.msrb.mxu3 %vm343_vm0, %v2296_v23  ;;  %v2756_v29 = vpop.permute.xlu1 %2755  ;;  %v6335_v48 = vpop.f32.mrf.mxu0 }
 0x139   : > { %4211 = vrot.lane.b32.xlu0 %v6172_v1, %s5329_s23  ;;  %4221 = vrot.lane.b32.xlu1 %v4193_v33, %s5329_s23  ;;  %v2786_v53 = vsel %vm1330_vm3, %v2756_v29, %v6178_v49  ;;  %v2294_v1 = vsel %vm827_vm2, %v6139_v6, %v6114_v28  ;;  %v4197_v28 = vld.sshfl [vmem:[#allocation1 + $0x30] sm:$0xff pattern:$0x75316420]  ;;  %v6309_v6 = vpop.f32.mrf.mxu3  ;;  %v2788_v33 = vsel %vm1330_vm3, %v6259_v32, %v6218_v61 }
 0x13a   : > { %v2754_v24 = vpop.permute.xlu0 %2753 }
 0x13b   : > { %4223 = vrot.lane.b32.xlu2 %v4194_v56, %s5329_s23  ;;  %v2785_v10 = vsel %vm1330_vm3, %v2754_v24, %v2756_v29  ;;  %v6327_v59 = vpop.f32.mrf.mxu1  ;;  %v2787_v56 = vsel %vm1330_vm3, %v6178_v49, %v6259_v32 }
 0x13d   : > { %4984 = vmatmul.msk.f32.vlgmr.msrb.gmra.mxu0 %vm339_vm1, %v6210_v21  ;;  %4986 = vmatmul.msk.f32.vlgmr.msrb.gmra.mxu1 %vm339_vm1, %v6210_v21  ;;  %v6290_v9 = vpop.permute.xlu2 %2773 }
 0x13e   : > { %4996 = vmatmul.msk.f32.vlgmr.msra.gmra.mxu2 %vm339_vm1, %v6210_v21  ;;  %4998 = vmatmul.msk.f32.vlgmr.msra.gmra.mxu3 %vm339_vm1, %v6210_v21 }
 0x13f   : > { %4999 = vmatpush.msk.msrb.mxu0 %vm343_vm0, %v2293_v55  ;;  %5001 = vmatpush.msk.msrb.mxu1 %vm343_vm0, %v2294_v1 }
 0x140   : > { %5012 = vmatpush.msk.msra.mxu2 %vm343_vm0, %v2785_v10  ;;  %5014 = vmatpush.msk.msra.mxu3 %vm343_vm0, %v2786_v53  ;;  %v2752_v22 = vpop.permute.xlu1 %2751  ;;  %v6331_v41 = vpop.f32.mrf.mxu2 }
 0x141   : > { %4219 = vrot.lane.b32.xlu1 %v6212_v40, %s5329_s23  ;;  %4225 = vrot.lane.b32.xlu0 %v4195_v12, %s5329_s23  ;;  %v2784_v44 = vsel %vm1330_vm3, %v2752_v22, %v2754_v24  ;;  %v4198_v40 = vld.sshfl [vmem:[#allocation1 + $0x38] sm:$0xff pattern:$0x75316420]  ;;  %v6337_v35 = vpop.f32.mrf.mxu3  ;;  %v6376_v32 = vpop.f32.mrf.mxu0 }
 0x142   : > { %v2750_v0 = vpop.permute.xlu0 %2749 }
 0x143   : > { %4229 = vrot.lane.b32.xlu2 %v4197_v28, %s5329_s23  ;;  %v2783_v5 = vsel %vm1330_vm3, %v2750_v0, %v2752_v22 }
 0x145   : > { %4992 = vmatmul.msk.f32.vlgmr.msra.gmra.mxu0 %vm339_vm1, %v6210_v21  ;;  %4994 = vmatmul.msk.f32.vlgmr.msra.gmra.mxu1 %vm339_vm1, %v6210_v21  ;;  %v6321_v13 = vpop.permute.xlu2 %2779 }
 0x146   : > { %5004 = vmatmul.msk.f32.vlgmr.msrb.gmra.mxu2 %vm339_vm1, %v6210_v21  ;;  %5006 = vmatmul.msk.f32.vlgmr.msrb.gmra.mxu3 %vm339_vm1, %v6210_v21 }
 0x147   : > { %5010 = vmatpush.msk.msra.mxu1 %vm343_vm0, %v2784_v44  ;;  %5008 = vmatpush.msk.msra.mxu0 %vm343_vm0, %v2783_v5 }
 0x148   : > { %v2766_v2 = vpop.permute.xlu1 %2765 }
 0x149   : > { %4231 = vrot.lane.b32.xlu0 %v4198_v40, %s5329_s23  ;;  %4233 = vrot.lane.b32.xlu1 %v4200_v47, %s5329_s23  ;;  %v6379_v55 = vpop.f32.mrf.mxu3 }
 0x14a   : > { %v2764_v36 = vpop.permute.xlu0 %2763 }
 0x14b   : > { %v2789_v23 = vsel %vm1330_vm3, %v6218_v61, %v2764_v36  ;;  %v2790_v39 = vsel %vm1330_vm3, %v2764_v36, %v2766_v2  ;;  %4227 = vrot.lane.b32.xlu2 %v4196_v3, %s5329_s23  ;;  %v6368_v61 = vpop.f32.mrf.mxu1 }
 0x14c   : > { %5020 = vmatpush.msk.msrb.mxu2 %vm343_vm0, %v2789_v23  ;;  %5022 = vmatpush.msk.msrb.mxu3 %vm343_vm0, %v2790_v39 }
 0x14d   : > { %5000 = vmatmul.msk.f32.vlgmr.msrb.gmra.mxu0 %vm339_vm1, %v6210_v21  ;;  %5002 = vmatmul.msk.f32.vlgmr.msrb.gmra.mxu1 %vm339_vm1, %v6210_v21  ;;  %v6357_v29 = vpop.permute.xlu2 %3703  ;;  %v6370_v21 = vpop.f32.mrf.mxu2 }
 0x14e   : > { %5013 = vmatmul.msk.f32.vlgmr.msra.gmra.mxu2 %vm339_vm1, %v6345_v27  ;;  %5015 = vmatmul.msk.f32.vlgmr.msra.gmra.mxu3 %vm339_vm1, %v6345_v27 }
 0x14f   : > { %5016 = vmatpush.msk.msrb.mxu0 %vm343_vm0, %v2787_v56  ;;  %5018 = vmatpush.msk.msrb.mxu1 %vm343_vm0, %v2788_v33 }
 0x150   : > { %v2772_v24 = vpop.permute.xlu1 %2771 }
 0x151   : > { %v2794_v53 = vsel %vm1330_vm3, %v2772_v24, %v6290_v9 }
 0x152   : > { %v2770_v10 = vpop.permute.xlu0 %2769  ;;  %5030 = vmatpush.msk.msra.mxu3 %vm343_vm0, %v2794_v53  ;;  %v6400_v47 = vpop.f32.mrf.mxu0 }
 0x153   : > { %v2793_v49 = vsel %vm1330_vm3, %v2770_v10, %v2772_v24  ;;  %v6391_v28 = vpop.f32.mrf.mxu1 }
 0x154   : > { %5028 = vmatpush.msk.msra.mxu2 %vm343_vm0, %v2793_v49 }
 0x155   : > { %5009 = vmatmul.msk.f32.vlgmr.msra.gmra.mxu0 %vm339_vm1, %v6345_v27  ;;  %5011 = vmatmul.msk.f32.vlgmr.msra.gmra.mxu1 %vm339_vm1, %v6345_v27  ;;  %v6385_v1 = vpop.permute.xlu2 %3699  ;;  %v6398_v40 = vpop.f32.mrf.mxu2 }
 0x156   : > { %5021 = vmatmul.msk.f32.vlgmr.msrb.gmra.mxu2 %vm339_vm1, %v6345_v27  ;;  %5023 = vmatmul.msk.f32.vlgmr.msrb.gmra.mxu3 %vm339_vm1, %v6345_v27 }
 0x158   : > { %v2778_v12 = vpop.permute.xlu1 %2777 }
 0x159   : > { %v2797_v0 = vsel %vm1330_vm3, %v2778_v12, %v6321_v13 }
 0x15a   : > { %v2768_v22 = vpop.permute.xlu0 %2767  ;;  %5036 = vmatpush.msk.msrb.mxu2 %vm343_vm0, %v2797_v0 }
 0x15b   : > { %v2791_v44 = vsel %vm1330_vm3, %v2766_v2, %v2768_v22  ;;  %v2792_v5 = vsel %vm1330_vm3, %v2768_v22, %v2770_v10  ;;  %v6414_v2 = vpop.f32.mrf.mxu3  ;;  %v6425_v24 = vpop.f32.mrf.mxu1 }
 0x15c   : > { %5024 = vmatpush.msk.msra.mxu0 %vm343_vm0, %v2791_v44  ;;  %5026 = vmatpush.msk.msra.mxu1 %vm343_vm0, %v2792_v5  ;;  %7004 = vst [vmem:[#allocation11_spill] sm:$0xff] %v6425_v24 }
 0x15d   : > { %5017 = vmatmul.msk.f32.vlgmr.msrb.gmra.mxu0 %vm339_vm1, %v6345_v27  ;;  %5019 = vmatmul.msk.f32.vlgmr.msrb.gmra.mxu1 %vm339_vm1, %v6345_v27  ;;  %v6412_v3 = vpop.permute.xlu2 %3713 }
 0x15e   : > { %5029 = vmatmul.msk.f32.vlgmr.msra.gmra.mxu2 %vm339_vm1, %v6345_v27  ;;  %5031 = vmatmul.msk.f32.vlgmr.msra.gmra.mxu3 %vm339_vm1, %v6345_v27 }
 0x15f   : > { %5045 = vmatpush.msk.msra.mxu2 %vm343_vm0, %v5832_v42  ;;  %v6432_v42 = vpop.f32.mrf.mxu2 }
 0x160   : > { %v2776_v36 = vpop.permute.xlu1 %2775 }
 0x161   : > { %v2795_v23 = vsel %vm1330_vm3, %v6290_v9, %v2776_v36  ;;  %v2796_v39 = vsel %vm1330_vm3, %v2776_v36, %v2778_v12  ;;  %v6434_v9 = vpop.f32.mrf.mxu0 }
 0x162   : > { %v2782_v33 = vpop.permute.xlu0 %2781  ;;  %5032 = vmatpush.msk.msrb.mxu0 %vm343_vm0, %v2795_v23  ;;  %5034 = vmatpush.msk.msrb.mxu1 %vm343_vm0, %v2796_v39  ;;  %7005 = vst [vmem:[#allocation12_spill] sm:$0xff] %v6434_v9 }
 0x163   : > { %v2798_v56 = vsel %vm1330_vm3, %v6321_v13, %v2782_v33  ;;  %v6440_v13 = vpop.f32.mrf.mxu3 }
 0x164   : > { %5038 = vmatpush.msk.msrb.mxu3 %vm343_vm0, %v2798_v56 }
 0x165   : > { %5025 = vmatmul.msk.f32.vlgmr.msra.gmra.mxu0 %vm339_vm1, %v6345_v27  ;;  %5027 = vmatmul.msk.f32.vlgmr.msra.gmra.mxu1 %vm339_vm1, %v6345_v27  ;;  %v6450_v10 = vpop.permute.xlu2 %3719 }
 0x166   : > { %5037 = vmatmul.msk.f32.vlgmr.msrb.gmra.mxu2 %vm339_vm1, %v6345_v27  ;;  %5039 = vmatmul.msk.f32.vlgmr.msrb.gmra.mxu3 %vm339_vm1, %v6345_v27 }
 0x167   : > { %5047 = vmatpush.msk.msra.mxu3 %vm343_vm0, %v5834_v43  ;;  %5043 = vmatpush.msk.msra.mxu1 %vm343_vm0, %v5898_v16  ;;  %v6459_v43 = vld [vmem:[%s6995_s1 + $0x30] sm:$0xff] }
 0x168   : > { %5053 = vmatpush.msk.msrb.mxu2 %vm343_vm0, %v5873_v62  ;;  %5041 = vmatpush.msk.msra.mxu0 %vm343_vm0, %v5896_v15  ;;  %v6467_v62 = vpop.f32.mrf.mxu2 }
 0x169   : > { %5055 = vmatpush.msk.msrb.mxu3 %vm343_vm0, %v5875_v63  ;;  %v6452_v53 = vpop.permute.xlu1 %3707 }
 0x16a   : > { %v3706_v49 = vpop.permute.xlu0 %3705  ;;  %v6461_v16 = vpop.f32.mrf.mxu1 }
 0x16b   : > { %v6469_v63 = vpop.f32.mrf.mxu0  ;;  %v6483_v15 = vpop.f32.mrf.mxu3 }
 0x16d   : > { %5033 = vmatmul.msk.f32.vlgmr.msrb.gmra.mxu0 %vm339_vm1, %v6345_v27  ;;  %5035 = vmatmul.msk.f32.vlgmr.msrb.gmra.mxu1 %vm339_vm1, %v6345_v27  ;;  %v6485_v22 = vpop.permute.xlu2 %3717 }
 0x16e   : > { %5046 = vmatmul.msk.f32.vlgmr.msra.gmra.mxu2 %vm339_vm1, %v6459_v43  ;;  %5048 = vmatmul.msk.f32.vlgmr.msra.gmra.mxu3 %vm339_vm1, %v6459_v43  ;;  %v3742_v24 = vsel %vm827_vm2, %v6485_v22, %v6450_v10 }
 0x16f   : > { %5061 = vmatpush.msk.msra.mxu2 %vm343_vm0, %v5880_v50  ;;  %5063 = vmatpush.msk.msra.mxu3 %vm343_vm0, %v5882_v25 }
 0x170   : > { %5051 = vmatpush.msk.msrb.mxu1 %vm343_vm0, %v5852_v4  ;;  %5049 = vmatpush.msk.msrb.mxu0 %vm343_vm0, %v5847_v51 }
 0x171   : > { %v3712_v27 = vpop.permute.xlu1 %3711  ;;  %v6501_v51 = vpop.f32.mrf.mxu2 }
 0x172   : > { %v3702_v12 = vpop.permute.xlu0 %3701  ;;  %v6491_v50 = vpop.f32.mrf.mxu1 }
 0x173   : > { %v6503_v4 = vpop.f32.mrf.mxu0 }
 0x175   : > { %5042 = vmatmul.msk.f32.vlgmr.msra.gmra.mxu0 %vm339_vm1, %v6459_v43  ;;  %5044 = vmatmul.msk.f32.vlgmr.msra.gmra.mxu1 %vm339_vm1, %v6459_v43  ;;  %v3732_v5 = vpop.permute.xlu2 %3731 }
 0x176   : > { %5054 = vmatmul.msk.f32.vlgmr.msrb.gmra.mxu2 %vm339_vm1, %v6459_v43  ;;  %5056 = vmatmul.msk.f32.vlgmr.msrb.gmra.mxu3 %vm339_vm1, %v6459_v43 }
 0x177   : > { %5069 = vmatpush.msk.msrb.mxu2 %vm343_vm0, %v5914_v20  ;;  %5071 = vmatpush.msk.msrb.mxu3 %vm343_vm0, %v5916_v46  ;;  %v3735_v20 = vsel %vm827_vm2, %v6357_v29, %v3706_v49  ;;  %v3736_v46 = vsel %vm827_vm2, %v3706_v49, %v6452_v53 }
 0x178   : > { %5057 = vmatpush.msk.msra.mxu0 %vm343_vm0, %v5930_v58  ;;  %5059 = vmatpush.msk.msra.mxu1 %vm343_vm0, %v5932_v17 }
 0x179   : > { %v6509_v25 = vpop.f32.mrf.mxu3  ;;  %v3710_v0 = vpop.permute.xlu1 %3709 }
 0x17a   : > { %v6511_v44 = vpop.permute.xlu0 %3715  ;;  %v6527_v58 = vpop.f32.mrf.mxu1 }
 0x17b   : > { %v6539_v33 = vpop.f32.mrf.mxu0  ;;  %v3740_v56 = vsel %vm827_vm2, %v6412_v3, %v6511_v44 }
 0x17d   : > { %5050 = vmatmul.msk.f32.vlgmr.msrb.gmra.mxu0 %vm339_vm1, %v6459_v43  ;;  %5052 = vmatmul.msk.f32.vlgmr.msrb.gmra.mxu1 %vm339_vm1, %v6459_v43  ;;  %v4208_v49 = vpop.permute.xlu2 %4207 }
 0x17e   : > { %5062 = vmatmul.msk.f32.vlgmr.msra.gmra.mxu2 %vm339_vm1, %v6459_v43  ;;  %5064 = vmatmul.msk.f32.vlgmr.msra.gmra.mxu3 %vm339_vm1, %v6459_v43 }
 0x17f   : > { %5078 = vmatpush.msk.msra.mxu2 %vm343_vm0, %v3735_v20  ;;  %5080 = vmatpush.msk.msra.mxu3 %vm343_vm0, %v3736_v46  ;;  %v3739_v20 = vsel %vm827_vm2, %v3712_v27, %v6412_v3  ;;  %v6573_v3 = vld [vmem:[%s6995_s1 + $0x38] sm:$0xff] }
 0x180   : > { %5067 = vmatpush.msk.msrb.mxu1 %vm343_vm0, %v5890_v19  ;;  %5065 = vmatpush.msk.msrb.mxu0 %vm343_vm0, %v5888_v14  ;;  %v6533_v17 = vpop.f32.mrf.mxu2  ;;  %v3733_v14 = vsel %vm827_vm2, %v6385_v1, %v3702_v12  ;;  %v3734_v19 = vsel %vm827_vm2, %v3702_v12, %v6357_v29 }
 0x181   : > { %v6535_v36 = vpop.f32.mrf.mxu3  ;;  %v6537_v23 = vpop.permute.xlu1 %3723 }
 0x182   : > { %v3722_v39 = vpop.permute.xlu0 %3721 }
 0x185   : > { %5058 = vmatmul.msk.f32.vlgmr.msra.gmra.mxu0 %vm339_vm1, %v6459_v43  ;;  %5060 = vmatmul.msk.f32.vlgmr.msra.gmra.mxu1 %vm339_vm1, %v6459_v43 }
 0x186   : > { %5070 = vmatmul.msk.f32.vlgmr.msrb.gmra.mxu2 %vm339_vm1, %v6459_v43  ;;  %5072 = vmatmul.msk.f32.vlgmr.msrb.gmra.mxu3 %vm339_vm1, %v6459_v43 }
 0x187   : > { %5074 = vmatpush.msk.msra.mxu0 %vm343_vm0, %v3733_v14  ;;  %5076 = vmatpush.msk.msra.mxu1 %vm343_vm0, %v3734_v19  ;;  %v3743_v14 = vsel %vm827_vm2, %v6450_v10, %v3722_v39  ;;  %v3737_v19 = vsel %vm827_vm2, %v6452_v53, %v3710_v0 }
 0x188   : > { %5086 = vmatpush.msk.msrb.mxu2 %vm343_vm0, %v3739_v20  ;;  %5088 = vmatpush.msk.msrb.mxu3 %vm343_vm0, %v3740_v56  ;;  %v6562_v1 = vpop.f32.mrf.mxu2  ;;  %v3744_v56 = vsel %vm827_vm2, %v3722_v39, %v6537_v23  ;;  %v3738_v20 = vsel %vm827_vm2, %v3710_v0, %v3712_v27 }
 0x189   : > { %v6564_v29 = vpop.f32.mrf.mxu3  ;;  %v3730_v46 = vpop.permute.xlu1 %3729 }
 0x18a   : > { %v6566_v12 = vpop.f32.mrf.mxu1  ;;  %v3728_v9 = vpop.permute.xlu0 %3727 }
 0x18b   : > { %7006 = vst [vmem:[#allocation13_spill] sm:$0xff] %v6566_v12  ;;  %v6568_v11 = vpop.f32.mrf.mxu0 }
 0x18c   : > { %7007 = vst [vmem:[#allocation14_spill] sm:$0xff] %v6568_v11 }
 0x18d   : > { %5066 = vmatmul.msk.f32.vlgmr.msrb.gmra.mxu0 %vm339_vm1, %v6459_v43  ;;  %5068 = vmatmul.msk.f32.vlgmr.msrb.gmra.mxu1 %vm339_vm1, %v6459_v43  ;;  %v6594_v43 = vpop.permute.xlu2 %4203 }
 0x18e   : > { %5079 = vmatmul.msk.f32.vlgmr.msra.gmra.mxu2 %vm339_vm1, %v6573_v3  ;;  %5081 = vmatmul.msk.f32.vlgmr.msra.gmra.mxu3 %vm339_vm1, %v6573_v3 }
 0x18f   : > { %5082 = vmatpush.msk.msrb.mxu0 %vm343_vm0, %v3737_v19  ;;  %5084 = vmatpush.msk.msrb.mxu1 %vm343_vm0, %v3738_v20  ;;  %v3747_v19 = vsel %vm827_vm2, %v3728_v9, %v3730_v46  ;;  %v3748_v20 = vsel %vm827_vm2, %v3730_v46, %v3732_v5 }
 0x190   : > { %5094 = vmatpush.msk.msra.mxu2 %vm343_vm0, %v3743_v14  ;;  %5096 = vmatpush.msk.msra.mxu3 %vm343_vm0, %v3744_v56  ;;  %v1206_v14 = vadd.f32 %v6379_v55, %v6223_v45  ;;  %v3741_v56 = vsel %vm827_vm2, %v6511_v44, %v6485_v22 }
 0x191   : > { %v6596_v39 = vpop.f32.mrf.mxu2  ;;  %v6598_v53 = vpop.f32.mrf.mxu3 }
 0x192   : > { %v6600_v27 = vpop.f32.mrf.mxu1  ;;  %v4206_v0 = vpop.permute.xlu1 %4205  ;;  %v1709_v45 = vadd.f32 %v6509_v25, %v1206_v14 }
 0x193   : > { %v3726_v11 = vpop.permute.xlu0 %3725  ;;  %v6602_v12 = vpop.f32.mrf.mxu0  ;;  %v4237_v25 = vsel %vm1330_vm3, %v4206_v0, %v4208_v49 }
 0x194   : > { %v3745_v14 = vsel %vm827_vm2, %v6537_v23, %v3726_v11 }
 0x195   : > { %5075 = vmatmul.msk.f32.vlgmr.msra.gmra.mxu0 %vm339_vm1, %v6573_v3  ;;  %5077 = vmatmul.msk.f32.vlgmr.msra.gmra.mxu1 %vm339_vm1, %v6573_v3  ;;  %v6633_v5 = vpop.permute.xlu2 %4217 }
 0x196   : > { %5087 = vmatmul.msk.f32.vlgmr.msrb.gmra.mxu2 %vm339_vm1, %v6573_v3  ;;  %5089 = vmatmul.msk.f32.vlgmr.msrb.gmra.mxu3 %vm339_vm1, %v6573_v3 }
 0x197   : > { %5090 = vmatpush.msk.msra.mxu0 %vm343_vm0, %v3741_v56  ;;  %5092 = vmatpush.msk.msra.mxu1 %vm343_vm0, %v3742_v24  ;;  %v1209_v24 = vadd.f32 %v6398_v40, %v6250_v38 }
 0x198   : > { %5102 = vmatpush.msk.msrb.mxu2 %vm343_vm0, %v3747_v19  ;;  %5104 = vmatpush.msk.msrb.mxu3 %vm343_vm0, %v3748_v20  ;;  %v1210_v20 = vadd.f32 %v6414_v2, %v6271_v34  ;;  %v5330_v2 = vmov 0  }
 0x199   : > { %v6627_v55 = vpop.f32.mrf.mxu2  ;;  %v1987_v44 = vpop.f32.mrf.mxu3  ;;  %v1712_v38 = vadd.f32 %v6533_v17, %v1209_v24  ;;  %5213 = vset.pattern.permute.xlu0 %v5330_v2  ;;  %v4657_v17 = vld [vmem:[%s6996_s2] sm:$0xff]  ;;  %v1202_v2 = vadd.f32 %v6337_v35, %v6175_v60 }
 0x19a   : > { %v6629_v10 = vadd.f32 %v1987_v44, %v1709_v45  ;;  %v6631_v22 = vpop.f32.mrf.mxu1  ;;  %v3746_v45 = vsel %vm827_vm2, %v3726_v11, %v3728_v9  ;;  %v1713_v40 = vadd.f32 %v6535_v36, %v1210_v20  ;;  %4660 = vperm.xlu0 %5213, %v4657_v17  }
 0x19b   : > { %v4210_v46 = vpop.permute.xlu0 %4209  ;;  %v4202_v8 = vpop.permute.xlu1 %4201  ;;  %v1705_v60 = vadd.f32 %v6483_v15, %v1202_v2 }
 0x19c   : > { %v6635_v56 = vpop.f32.mrf.mxu0  ;;  %v4238_v19 = vsel %vm1330_vm3, %v4208_v49, %v4210_v46  ;;  %v4235_v24 = vsel %vm1330_vm3, %v4202_v8, %v6594_v43  ;;  %v1214_v8 = vadd.f32 %v6440_v13, %v6309_v6 }
 0x19d   : > { %5083 = vmatmul.msk.f32.vlgmr.msrb.gmra.mxu0 %vm339_vm1, %v6573_v3  ;;  %5085 = vmatmul.msk.f32.vlgmr.msrb.gmra.mxu1 %vm339_vm1, %v6573_v3 }
 0x19e   : > { %5095 = vmatmul.msk.f32.vlgmr.msra.gmra.mxu2 %vm339_vm1, %v6573_v3  ;;  %5097 = vmatmul.msk.f32.vlgmr.msra.gmra.mxu3 %vm339_vm1, %v6573_v3 }
 0x19f   : > { %5098 = vmatpush.msk.msrb.mxu0 %vm343_vm0, %v3745_v14  ;;  %5100 = vmatpush.msk.msrb.mxu1 %vm343_vm0, %v3746_v45  ;;  %v1213_v45 = vadd.f32 %v6432_v42, %v6297_v54  ;;  %v1717_v54 = vadd.f32 %v6564_v29, %v1214_v8  ;;  %v1201_v29 = vadd.f32 %v6331_v41, %v6159_v26 }
 0x1a0   : > { %5111 = vmatpush.msk.msra.mxu2 %vm343_vm0, %v4237_v25  ;;  %5113 = vmatpush.msk.msra.mxu3 %vm343_vm0, %v4238_v19  ;;  %v6673_v19 = vpop.permute.xlu2 %4223 }
 0x1a1   : > { %v2047_v34 = vpop.f32.mrf.mxu2  ;;  %v2067_v11 = vpop.f32.mrf.mxu3  ;;  %v1704_v26 = vadd.f32 %v6467_v62, %v1201_v29  ;;  %v2153_v62 = vadd.f32 %v6598_v53, %v1705_v60  ;;  %v1205_v53 = vadd.f32 %v6370_v21, %v6205_v57 }
 0x1a2   : > { %v6660_v9 = vadd.f32 %v2047_v34, %v1712_v38  ;;  %v6662_v23 = vadd.f32 %v2067_v11, %v1713_v40  ;;  %v6664_v49 = vpop.f32.mrf.mxu1  ;;  %v4236_v38 = vsel %vm1330_vm3, %v6594_v43, %v4206_v0  ;;  %v1716_v40 = vadd.f32 %v6562_v1, %v1213_v45  ;;  %v6707_v1 = vld [vmem:[%s6995_s1 + $0x40] sm:$0xff] }
 0x1a3   : > { %v4214_v44 = vpop.permute.xlu0 %4213  ;;  %v4216_v36 = vpop.permute.xlu1 %4215  ;;  %v2152_v35 = vadd.f32 %v6596_v39, %v1704_v26  ;;  %v1708_v21 = vadd.f32 %v6501_v51, %v1205_v53 }
 0x1a4   : > { %v6671_v25 = vpop.f32.mrf.mxu0  ;;  %v4241_v20 = vsel %vm1330_vm3, %v4214_v44, %v4216_v36  ;;  %v4242_v14 = vsel %vm1330_vm3, %v4216_v36, %v6633_v5 }
 0x1a5   : > { %5091 = vmatmul.msk.f32.vlgmr.msra.gmra.mxu0 %vm339_vm1, %v6573_v3  ;;  %5093 = vmatmul.msk.f32.vlgmr.msra.gmra.mxu1 %vm339_vm1, %v6573_v3 }
 0x1a6   : > { %5103 = vmatmul.msk.f32.vlgmr.msrb.gmra.mxu2 %vm339_vm1, %v6573_v3  ;;  %5105 = vmatmul.msk.f32.vlgmr.msrb.gmra.mxu3 %vm339_vm1, %v6573_v3 }
 0x1a7   : > { %5109 = vmatpush.msk.msra.mxu1 %vm343_vm0, %v4236_v38  ;;  %5107 = vmatpush.msk.msra.mxu0 %vm343_vm0, %v4235_v24 }
 0x1a8   : > { %5119 = vmatpush.msk.msrb.mxu2 %vm343_vm0, %v4241_v20  ;;  %5121 = vmatpush.msk.msrb.mxu3 %vm343_vm0, %v4242_v14  ;;  %v1200_v20 = vadd.f32 %v6327_v59, %v6155_v7  ;;  %v4230_v7 = vpop.permute.xlu2 %4229  ;;  %v1199_v59 = vadd.f32 %v6335_v48, %v6170_v52 }
 0x1a9   : > { %v2127_v6 = vpop.f32.mrf.mxu2  ;;  %v2147_v42 = vpop.f32.mrf.mxu3 }
 0x1aa   : > { %v6698_v13 = vadd.f32 %v2127_v6, %v1716_v40  ;;  %v6700_v43 = vadd.f32 %v2147_v42, %v1717_v54  ;;  %v6702_v0 = vpop.f32.mrf.mxu1  ;;  %v1703_v41 = vadd.f32 %v6461_v16, %v1200_v20  ;;  %v1702_v15 = vadd.f32 %v6469_v63, %v1199_v59 }
 0x1ab   : > { %v4212_v34 = vpop.permute.xlu0 %4211  ;;  %v4222_v11 = vpop.permute.xlu1 %4221  ;;  %v1204_v54 = vadd.f32 %v6368_v61, %v6201_v31  ;;  %v1203_v31 = vadd.f32 %v6376_v32, %v6216_v18 }
 0x1ac   : > { %v4239_v17 = vsel %vm1330_vm3, %v4210_v46, %v4212_v34  ;;  %v4240_v36 = vsel %vm1330_vm3, %v4212_v34, %v4214_v44  ;;  %v6715_v24 = vpop.f32.mrf.mxu0  ;;  %v4245_v14 = vsel %vm1330_vm3, %v4222_v11, %v6673_v19  ;;  %v2150_v16 = vadd.f32 %v6602_v12, %v1702_v15  ;;  %v7009_v15 = vld [vmem:[#allocation11_spill] sm:$0xff] }
 0x1ad   : > { %5099 = vmatmul.msk.f32.vlgmr.msrb.gmra.mxu0 %vm339_vm1, %v6573_v3  ;;  %5101 = vmatmul.msk.f32.vlgmr.msrb.gmra.mxu1 %vm339_vm1, %v6573_v3  ;;  %v2151_v3 = vadd.f32 %v6600_v27, %v1703_v41  ;;  %v1707_v61 = vadd.f32 %v6491_v50, %v1204_v54  ;;  %v2156_v12 = vadd.f32 %v6627_v55, %v1708_v21 }
 0x1ae   : > { %5112 = vmatmul.msk.f32.vlgmr.msra.gmra.mxu2 %vm339_vm1, %v6707_v1  ;;  %5114 = vmatmul.msk.f32.vlgmr.msra.gmra.mxu3 %vm339_vm1, %v6707_v1 }
 0x1af   : > { %5115 = vmatpush.msk.msrb.mxu0 %vm343_vm0, %v4239_v17  ;;  %5117 = vmatpush.msk.msrb.mxu1 %vm343_vm0, %v4240_v36  ;;  %v1208_v17 = vadd.f32 %v6391_v28, %v6247_v37  ;;  %v1207_v37 = vadd.f32 %v6400_v47, %v6265_v30 }
 0x1b0   : > { %5127 = vmatpush.msk.msra.mxu2 %vm343_vm0, %v4245_v14  ;;  %v4228_v51 = vpop.permute.xlu2 %4227 }
 0x1b1   : > { %v2389_v46 = vpop.f32.mrf.mxu2  ;;  %v2409_v44 = vpop.f32.mrf.mxu3  ;;  %v4248_v36 = vsel %vm1330_vm3, %v4228_v51, %v4230_v7  ;;  %v1711_v28 = vadd.f32 %v6527_v58, %v1208_v17  ;;  %v1710_v14 = vadd.f32 %v6539_v33, %v1207_v37  ;;  %v7010_v33 = vld [vmem:[#allocation10_spill] sm:$0xff] }
 0x1b2   : > { %v6741_v45 = vadd.f32 %v2389_v46, %v2152_v35  ;;  %v6743_v52 = vadd.f32 %v2409_v44, %v2153_v62  ;;  %v2369_v48 = vpop.f32.mrf.mxu1  ;;  %v7008_v62 = vld [vmem:[#allocation9_spill] sm:$0xff]  ;;  %v7013_v44 = vld [vmem:[#allocation14_spill] sm:$0xff] }
 0x1b3   : > { %v6746_v8 = vadd.f32 %v2369_v48, %v2151_v3  ;;  %v4220_v39 = vpop.permute.xlu1 %4219  ;;  %v4226_v38 = vpop.permute.xlu0 %4225  ;;  %v2159_v26 = vadd.f32 %v6664_v49, %v1711_v28  ;;  %v2158_v58 = vadd.f32 %v6671_v25, %v1710_v14  ;;  %v1212_v3 = vadd.f32 %v7009_v15, %v7008_v62  ;;  %v7012_v49 = vld [vmem:[#allocation13_spill] sm:$0xff] }
 0x1b4   : > { %v4243_v63 = vsel %vm1330_vm3, %v6633_v5, %v4220_v39  ;;  %v4244_v27 = vsel %vm1330_vm3, %v4220_v39, %v4222_v11  ;;  %v2349_v40 = vpop.f32.mrf.mxu0  ;;  %v4246_v57 = vsel %vm1330_vm3, %v6673_v19, %v4226_v38  ;;  %v1706_v5 = vadd.f32 %v6503_v4, %v1203_v31 }
 0x1b5   : > { %v6755_v6 = vadd.f32 %v2349_v40, %v2150_v16  ;;  %5108 = vmatmul.msk.f32.vlgmr.msra.gmra.mxu0 %vm339_vm1, %v6707_v1  ;;  %5110 = vmatmul.msk.f32.vlgmr.msra.gmra.mxu1 %vm339_vm1, %v6707_v1  ;;  %v2155_v19 = vadd.f32 %v6631_v22, %v1707_v61  ;;  %v4247_v22 = vsel %vm1330_vm3, %v4226_v38, %v4228_v51 }
 0x1b6   : > { %5120 = vmatmul.msk.f32.vlgmr.msrb.gmra.mxu2 %vm339_vm1, %v6707_v1  ;;  %5122 = vmatmul.msk.f32.vlgmr.msrb.gmra.mxu3 %vm339_vm1, %v6707_v1  ;;  %v2154_v50 = vadd.f32 %v6635_v56, %v1706_v5  ;;  %v1715_v25 = vadd.f32 %v7012_v49, %v1212_v3 }
 0x1b7   : > { %5123 = vmatpush.msk.msra.mxu0 %vm343_vm0, %v4243_v63  ;;  %5125 = vmatpush.msk.msra.mxu1 %vm343_vm0, %v4244_v27 }
 0x1b8   : > { %5129 = vmatpush.msk.msra.mxu3 %vm343_vm0, %v4246_v57  ;;  %v2163_v16 = vadd.f32 %v6702_v0, %v1715_v25 }
 0x1b9   : > { %v2469_v42 = vpop.f32.mrf.mxu2  ;;  %v2489_v34 = vpop.f32.mrf.mxu3 }
 0x1ba   : > { %v6777_v11 = vadd.f32 %v2469_v42, %v2156_v12  ;;  %v6780_v18 = vadd.f32 %v2489_v34, %v6629_v10  ;;  %v2449_v32 = vpop.f32.mrf.mxu1 }
 0x1bb   : > { %v6783_v29 = vadd.f32 %v2449_v32, %v2155_v19  ;;  %v4232_v55 = vpop.permute.xlu0 %4231  ;;  %v4234_v2 = vpop.permute.xlu1 %4233 }
 0x1bc   : > { %v2429_v4 = vpop.f32.mrf.mxu0  ;;  %v4249_v10 = vsel %vm1330_vm3, %v4230_v7, %v4232_v55  ;;  %v4250_v56 = vsel %vm1330_vm3, %v4232_v55, %v4234_v2 }
 0x1bd   : > { %v2656_v20 = vadd.f32 %v2429_v4, %v2154_v50  ;;  %5116 = vmatmul.msk.f32.vlgmr.msrb.gmra.mxu0 %vm339_vm1, %v6707_v1  ;;  %5118 = vmatmul.msk.f32.vlgmr.msrb.gmra.mxu1 %vm339_vm1, %v6707_v1 }
 0x1be   : > { %5128 = vmatmul.msk.f32.vlgmr.msra.gmra.mxu2 %vm339_vm1, %v6707_v1  ;;  %5130 = vmatmul.msk.f32.vlgmr.msra.gmra.mxu3 %vm339_vm1, %v6707_v1 }
 0x1bf   : > { %5131 = vmatpush.msk.msrb.mxu0 %vm343_vm0, %v4247_v22  ;;  %5133 = vmatpush.msk.msrb.mxu1 %vm343_vm0, %v4248_v36 }
 0x1c0   : > { %5135 = vmatpush.msk.msrb.mxu2 %vm343_vm0, %v4249_v10  ;;  %5137 = vmatpush.msk.msrb.mxu3 %vm343_vm0, %v4250_v56 }
 0x1c1   : > { %v2549_v60 = vpop.f32.mrf.mxu2  ;;  %v2569_v7 = vpop.f32.mrf.mxu3 }
 0x1c2   : > { %v2662_v59 = vadd.f32 %v2549_v60, %v6660_v9  ;;  %v2663_v30 = vadd.f32 %v2569_v7, %v6662_v23  ;;  %v2529_v47 = vpop.f32.mrf.mxu1  ;;  %v7011_v9 = vld [vmem:[#allocation12_spill] sm:$0xff] }
 0x1c3   : > { %v2661_v41 = vadd.f32 %v2529_v47, %v2159_v26  ;;  %v1211_v23 = vadd.f32 %v7011_v9, %v7010_v33 }
 0x1c4   : > { %v2509_v35 = vpop.f32.mrf.mxu0 }
 0x1c5   : > { %v2660_v46 = vadd.f32 %v2509_v35, %v2158_v58  ;;  %5124 = vmatmul.msk.f32.vlgmr.msra.gmra.mxu0 %vm339_vm1, %v6707_v1  ;;  %5126 = vmatmul.msk.f32.vlgmr.msra.gmra.mxu1 %vm339_vm1, %v6707_v1  ;;  %v1714_v48 = vadd.f32 %v7013_v44, %v1211_v23 }
 0x1c6   : > { %5136 = vmatmul.msk.f32.vlgmr.msrb.gmra.mxu2 %vm339_vm1, %v6707_v1  ;;  %5138 = vmatmul.msk.f32.vlgmr.msrb.gmra.mxu3 %vm339_vm1, %v6707_v1 }
 0x1c7   : > { %v2162_v40 = vadd.f32 %v6715_v24, %v1714_v48 }
 0x1c9   : > { %v2629_v39 = vpop.f32.mrf.mxu2  ;;  %v2649_v38 = vpop.f32.mrf.mxu3 }
 0x1ca   : > { %v2666_v53 = vadd.f32 %v2629_v39, %v6698_v13  ;;  %v2667_v63 = vadd.f32 %v2649_v38, %v6700_v43  ;;  %v2609_v27 = vpop.f32.mrf.mxu1 }
 0x1cb   : > { %v2665_v54 = vadd.f32 %v2609_v27, %v2163_v16 }
 0x1cc   : > { %v2589_v57 = vpop.f32.mrf.mxu0 }
 0x1cd   : > { %v2664_v21 = vadd.f32 %v2589_v57, %v2162_v40  ;;  %5132 = vmatmul.msk.f32.vlgmr.msrb.gmra.mxu0 %vm339_vm1, %v6707_v1  ;;  %5134 = vmatmul.msk.f32.vlgmr.msrb.gmra.mxu1 %vm339_vm1, %v6707_v1 }
 0x1d1   : > { %v2891_v31 = vpop.f32.mrf.mxu2  ;;  %v2911_v0 = vpop.f32.mrf.mxu3 }
 0x1d2   : > { %v3156_v61 = vadd.f32 %v2891_v31, %v6741_v45  ;;  %v3157_v13 = vadd.f32 %v2911_v0, %v6743_v52  ;;  %v2871_v12 = vpop.f32.mrf.mxu1 }
 0x1d3   : > { %v3155_v43 = vadd.f32 %v2871_v12, %v6746_v8 }
 0x1d4   : > { %v2851_v51 = vpop.f32.mrf.mxu0 }
 0x1d5   : > { %v6837_v24 = vadd.f32 %v2851_v51, %v6755_v6 }
 0x1d9   : > { %v2971_v5 = vpop.f32.mrf.mxu2  ;;  %v2991_v19 = vpop.f32.mrf.mxu3 }
 0x1da   : > { %v6840_v42 = vadd.f32 %v2971_v5, %v6777_v11  ;;  %v6843_v1 = vadd.f32 %v2991_v19, %v6780_v18  ;;  %v2951_v34 = vpop.f32.mrf.mxu1 }
 0x1db   : > { %v6846_v45 = vadd.f32 %v2951_v34, %v6783_v29 }
 0x1dc   : > { %v2931_v52 = vpop.f32.mrf.mxu0 }
 0x1dd   : > { %v6848_v32 = vadd.f32 %v2931_v52, %v2656_v20 }
 0x1e1   : > { %v3051_v8 = vpop.f32.mrf.mxu2  ;;  %v3071_v50 = vpop.f32.mrf.mxu3 }
 0x1e2   : > { %v6850_v55 = vadd.f32 %v3051_v8, %v2662_v59  ;;  %v6852_v6 = vadd.f32 %v3071_v50, %v2663_v30  ;;  %v3031_v2 = vpop.f32.mrf.mxu1 }
 0x1e3   : > { %v6854_v17 = vadd.f32 %v3031_v2, %v2661_v41 }
 0x1e4   : > { %v3011_v11 = vpop.f32.mrf.mxu0 }
 0x1e5   : > { %v6856_v4 = vadd.f32 %v3011_v11, %v2660_v46 }
 0x1e9   : > { %v3131_v18 = vpop.f32.mrf.mxu2  ;;  %v3151_v22 = vpop.f32.mrf.mxu3 }
 0x1ea   : > { %v6858_v36 = vadd.f32 %v3131_v18, %v2666_v53  ;;  %v6860_v29 = vadd.f32 %v3151_v22, %v2667_v63  ;;  %v3111_v20 = vpop.f32.mrf.mxu1 }
 0x1eb   : > { %v6862_v10 = vadd.f32 %v3111_v20, %v2665_v54 }
 0x1ec   : > { %v3091_v56 = vpop.f32.mrf.mxu0 }
 0x1ed   : > { %v6864_v37 = vadd.f32 %v3091_v56, %v2664_v21 }
 0x1f1   : > { %v3339_v28 = vpop.f32.mrf.mxu2  ;;  %v3359_v14 = vpop.f32.mrf.mxu3 }
 0x1f2   : > { %v3319_v26 = vpop.f32.mrf.mxu1  ;;  %v3604_v31 = vadd.f32 %v3339_v28, %v3156_v61  ;;  %v3605_v0 = vadd.f32 %v3359_v14, %v3157_v13 }
 0x1f3   : > { %v3603_v12 = vadd.f32 %v3319_v26, %v3155_v43 }
 0x1f4   : > { %v3299_v60 = vpop.f32.mrf.mxu0 }
 0x1f5   : > { %v3602_v34 = vadd.f32 %v3299_v60, %v6837_v24 }
 0x1f9   : > { %v3419_v7 = vpop.f32.mrf.mxu2  ;;  %v3439_v59 = vpop.f32.mrf.mxu3 }
 0x1fa   : > { %v3399_v30 = vpop.f32.mrf.mxu1  ;;  %v3608_v14 = vadd.f32 %v3419_v7, %v6840_v42  ;;  %v3609_v24 = vadd.f32 %v3439_v59, %v6843_v1 }
 0x1fb   : > { %v3607_v26 = vadd.f32 %v3399_v30, %v6846_v45 }
 0x1fc   : > { %v3379_v47 = vpop.f32.mrf.mxu0 }
 0x201   : > { %v6866_v58 = vpop.f32.mrf.mxu2  ;;  %v6868_v41 = vpop.f32.mrf.mxu3 }
 0x202   : > { %v6870_v35 = vpop.f32.mrf.mxu1 }
 0x204   : > { %v6872_v62 = vpop.f32.mrf.mxu0 }
 0x209   : > { %v6874_v15 = vpop.f32.mrf.mxu2  ;;  %v6876_v3 = vpop.f32.mrf.mxu3 }
 0x20a   : > { %v6878_v46 = vpop.f32.mrf.mxu1 }
 0x20c   : > { %v6880_v33 = vpop.f32.mrf.mxu0  ;;  %v6893_v19 = vpop.permute.xlu0 %4660 }
 0x211   : > { %v3841_v9 = vpop.f32.mrf.mxu2  ;;  %v3861_v23 = vpop.f32.mrf.mxu3 }
 0x212   : > { %v3821_v49 = vpop.f32.mrf.mxu1  ;;  %v4106_v51 = vadd.f32 %v3841_v9, %v3604_v31  ;;  %v4107_v5 = vadd.f32 %v3861_v23, %v3605_v0 }
 0x213   : > { %v4105_v52 = vadd.f32 %v3821_v49, %v3603_v12  ;;  %v3606_v49 = vadd.f32 %v3379_v47, %v6848_v32  ;;  %v3612_v47 = vadd.f32 %v6866_v58, %v6850_v55 }
 0x214   : > { %v3801_v25 = vpop.f32.mrf.mxu0 }
 0x215   : > { %v4104_v22 = vadd.f32 %v3801_v25, %v3602_v34 }
 0x219   : > { %v3921_v44 = vpop.f32.mrf.mxu2  ;;  %v3941_v48 = vpop.f32.mrf.mxu3 }
 0x21a   : > { %v3901_v16 = vpop.f32.mrf.mxu1  ;;  %v4110_v9 = vadd.f32 %v3921_v44, %v3608_v14  ;;  %v4111_v23 = vadd.f32 %v3941_v48, %v3609_v24 }
 0x21b   : > { %v4109_v42 = vadd.f32 %v3901_v16, %v3607_v26  ;;  %v3613_v16 = vadd.f32 %v6868_v41, %v6852_v6 }
 0x21c   : > { %v3881_v39 = vpop.f32.mrf.mxu0 }
 0x21d   : > { %v4108_v0 = vadd.f32 %v3881_v39, %v3606_v49  ;;  %v3611_v39 = vadd.f32 %v6870_v35, %v6854_v17 }
 0x221   : > { %v4001_v38 = vpop.f32.mrf.mxu2  ;;  %v4021_v53 = vpop.f32.mrf.mxu3 }
 0x222   : > { %v3981_v63 = vpop.f32.mrf.mxu1  ;;  %v4115_v34 = vadd.f32 %v4021_v53, %v3613_v16 }
 0x224   : > { %v6882_v27 = vpop.f32.mrf.mxu0 }
 0x229   : > { %v6884_v40 = vpop.f32.mrf.mxu2  ;;  %v6886_v54 = vpop.f32.mrf.mxu3 }
 0x22a   : > { %v6888_v57 = vpop.f32.mrf.mxu1 }
 0x22c   : > { %v6890_v21 = vpop.f32.mrf.mxu0 }
 0x231   : > { %v4343_v8 = vpop.f32.mrf.mxu2  ;;  %v4363_v50 = vpop.f32.mrf.mxu3 }
 0x232   : > { %v4608_v2 = vadd.f32 %v4343_v8, %v4106_v51  ;;  %v4609_v11 = vadd.f32 %v4363_v50, %v4107_v5  ;;  %v4323_v18 = vpop.f32.mrf.mxu1  ;;  %v4114_v5 = vadd.f32 %v4001_v38, %v3612_v47  ;;  %v4113_v8 = vadd.f32 %v3981_v63, %v3611_v39 }
 0x233   : > { %v4607_v20 = vadd.f32 %v4323_v18, %v4105_v52  ;;  %v3610_v52 = vadd.f32 %v6872_v62, %v6856_v4 }
 0x234   : > { %v4665_v56 = vadd.f32 %v6893_v19, %v4608_v2  ;;  %v4666_v61 = vadd.f32 %v6893_v19, %v4609_v11  ;;  %v4303_v13 = vpop.f32.mrf.mxu0  ;;  %v3616_v2 = vadd.f32 %v6874_v15, %v6858_v36  ;;  %v3617_v11 = vadd.f32 %v6876_v3, %v6860_v29 }
 0x235   : > { %v4606_v43 = vadd.f32 %v4303_v13, %v4104_v22  ;;  %v4664_v28 = vadd.f32 %v6893_v19, %v4607_v20  ;;  %v4112_v17 = vadd.f32 %v6882_v27, %v3610_v52  ;;  %v3615_v27 = vadd.f32 %v6878_v46, %v6862_v10 }
 0x236   : > { %4681 = vst [vmem:[%s6901_s5 + $0x10] sm:$0xff] %v4665_v56  ;;  %v4118_v22 = vadd.f32 %v6884_v40, %v3616_v2  ;;  %v4119_v20 = vadd.f32 %v6886_v54, %v3617_v11  ;;  %v3614_v36 = vadd.f32 %v6880_v33, %v6864_v37 }
 0x237   : > { %4682 = vst [vmem:[%s6901_s5 + $0x18] sm:$0xff] %v4666_v61  ;;  %v4663_v60 = vadd.f32 %v6893_v19, %v4606_v43  ;;  %v4117_v15 = vadd.f32 %v6888_v57, %v3615_v27 }
 0x238   : > { %4680 = vst [vmem:[%s6901_s5 + $0x8] sm:$0xff] %v4664_v28  ;;  %v4116_v54 = vadd.f32 %v6890_v21, %v3614_v36 }
 0x239   : > { %4679 = vst [vmem:[%s6901_s5] sm:$0xff] %v4663_v60  ;;  %v4423_v1 = vpop.f32.mrf.mxu2  ;;  %v4443_v7 = vpop.f32.mrf.mxu3 }
 0x23a   : > { %v4612_v59 = vadd.f32 %v4423_v1, %v4110_v9  ;;  %v4613_v25 = vadd.f32 %v4443_v7, %v4111_v23  ;;  %v4403_v31 = vpop.f32.mrf.mxu1 }
 0x23b   : > { %v4611_v45 = vadd.f32 %v4403_v31, %v4109_v42 }
 0x23c   : > { %v4669_v30 = vadd.f32 %v6893_v19, %v4612_v59  ;;  %v4670_v44 = vadd.f32 %v6893_v19, %v4613_v25  ;;  %v4383_v48 = vpop.f32.mrf.mxu0 }
 0x23d   : > { %v4610_v12 = vadd.f32 %v4383_v48, %v4108_v0  ;;  %v4668_v32 = vadd.f32 %v6893_v19, %v4611_v45 }
 0x23e   : > { %4685 = vst [vmem:[%s6901_s5 + $0x30] sm:$0xff] %v4669_v30 }
 0x23f   : > { %4686 = vst [vmem:[%s6901_s5 + $0x38] sm:$0xff] %v4670_v44  ;;  %v4667_v51 = vadd.f32 %v6893_v19, %v4610_v12 }
 0x240   : > { %4684 = vst [vmem:[%s6901_s5 + $0x28] sm:$0xff] %v4668_v32 }
 0x241   : > { %4683 = vst [vmem:[%s6901_s5 + $0x20] sm:$0xff] %v4667_v51  ;;  %v4503_v55 = vpop.f32.mrf.mxu2  ;;  %v4523_v58 = vpop.f32.mrf.mxu3 }
 0x242   : > { %v4616_v6 = vadd.f32 %v4503_v55, %v4114_v5  ;;  %v4617_v41 = vadd.f32 %v4523_v58, %v4115_v34  ;;  %v4483_v50 = vpop.f32.mrf.mxu1 }
 0x243   : > { %v4615_v35 = vadd.f32 %v4483_v50, %v4113_v8 }
 0x244   : > { %v4673_v38 = vadd.f32 %v6893_v19, %v4616_v6  ;;  %v4674_v53 = vadd.f32 %v6893_v19, %v4617_v41  ;;  %v4463_v4 = vpop.f32.mrf.mxu0 }
 0x245   : > { %v4614_v62 = vadd.f32 %v4463_v4, %v4112_v17  ;;  %v4672_v63 = vadd.f32 %v6893_v19, %v4615_v35 }
 0x246   : > { %4689 = vst [vmem:[%s6901_s5 + $0x50] sm:$0xff] %v4673_v38 }
 0x247   : > { %4690 = vst [vmem:[%s6901_s5 + $0x58] sm:$0xff] %v4674_v53  ;;  %v4671_v18 = vadd.f32 %v6893_v19, %v4614_v62 }
 0x248   : > { %4688 = vst [vmem:[%s6901_s5 + $0x48] sm:$0xff] %v4672_v63 }
 0x249   : > { %4687 = vst [vmem:[%s6901_s5 + $0x40] sm:$0xff] %v4671_v18  ;;  %v4583_v29 = vpop.f32.mrf.mxu2  ;;  %v4603_v3 = vpop.f32.mrf.mxu3 }
 0x24a   : > { %v4620_v10 = vadd.f32 %v4583_v29, %v4118_v22  ;;  %v4621_v46 = vadd.f32 %v4603_v3, %v4119_v20  ;;  %v4563_v40 = vpop.f32.mrf.mxu1 }
 0x24b   : > { %v4619_v37 = vadd.f32 %v4563_v40, %v4117_v15 }
 0x24c   : > { %v4677_v33 = vadd.f32 %v6893_v19, %v4620_v10  ;;  %v4678_v57 = vadd.f32 %v6893_v19, %v4621_v46  ;;  %v4543_v56 = vpop.f32.mrf.mxu0 }
 0x24d   : > { %v4618_v61 = vadd.f32 %v4543_v56, %v4116_v54  ;;  %v4676_v13 = vadd.f32 %v6893_v19, %v4619_v37 }
 0x24e   : > { %4693 = vst [vmem:[%s6901_s5 + $0x70] sm:$0xff] %v4677_v33 }
 0x24f   : > { %4694 = vst [vmem:[%s6901_s5 + $0x78] sm:$0xff] %v4678_v57  ;;  %v4675_v43 = vadd.f32 %v6893_v19, %v4618_v61 }
 0x250   : > { %4692 = vst [vmem:[%s6901_s5 + $0x68] sm:$0xff] %v4676_v13 }
 0x251   : > { %4691 = vst [vmem:[%s6901_s5 + $0x60] sm:$0xff] %v4675_v43 }
 0x252   : > { %5271 = shalt.err (!%p5268_p13)
}
 0x253   : > { %5150 = dma.vmem_to_hbm [thread:$0]  (%p5402_p9), %s4712_s9, 2048, %s4714_s10, %s4696_s18  }
 0x254 PF: > { %s4725_s11 = sand.u32 1, %s5306_s12   ;;  %p5157_p0 = pnand %p4839_p12, %p5409_p11 }
 0x255   : > { %s4726_s30 = scalar_lea.sflag [#allocation5], %s4725_s11 }
 0x256   : > { %p5158_p2 = pneg %p5157_p0 }
 0x258   : > { %5301 = dma.done.wait (%p5158_p2), %s4726_s30, 2048  }
 0x259   : > { %5303 = vsyncadd (%p5158_p2), %s4726_s30, 4294965248  ;;  %s19_s17 = sadd.s32 1, %s5326_s17   ;;  %s7014_s12 = smov %s5310_s13 }
 0x25a   : > { %p16_p1 = scmp.ge.s32.totalorder %s19_s17, 4   ;;  %s7015_s13 = smov %s5314_s14 }
 0x25b   : > { %s7016_s14 = smov %s5407_s26  ;;  %s7017_s15 = smov %s5322_s16 }
 0x25c   : > { %s7018_s16 = smov %s7020_s20  ;;  %18 = sbr.rel (!%p16_p1) target bundleno = 6 (0x6), region = 126 }
 0x261   :  { %4732 = vsyncpa [#allocation4], 1 }
 0x262   :  { %4734 = vsyncpa [#allocation4 + $0x1], 1 }
 0x263   :  { %4735 = vsyncpa [#allocation5], 1 }
 0x264   :  { %4737 = vsyncpa [#allocation5 + $0x1], 1 }

</bundles_post_ra>
